<compile_context>
chip_gen: v6e
topology: v6e:2x2x1
jax: 0.10.0
libtpu: 0.0.40
codegen_flags: <defaults>
</compile_context>

<pallas_src>
import math
import functools

import numpy as np
import jax
import jax.numpy as jnp
from jax.experimental import pallas as pl
from jax.experimental.pallas import tpu as pltpu  # TPU backend (Mosaic)

EPS = 1e-5        # nn.LayerNorm default
NEG_INF = -1e30   # finite "-inf" for the additive attention mask


def _layernorm(x, g, b):
    mu = jnp.mean(x, axis=-1, keepdims=True)
    var = jnp.mean((x - mu) ** 2, axis=-1, keepdims=True)
    return (x - mu) * jax.lax.rsqrt(var + EPS) * g + b


# ---------------------------------------------------------------------------
# Fused kernel: encode_inputs + all nn.TransformerEncoderLayer's.
# One grid step == one batch element; weights have constant index_maps so they
# stay resident in VMEM across grid steps.
# ---------------------------------------------------------------------------
def fused_encoder_kernel(x_ref, pe_ref, mask_ref, encln_ref,
                         wqkv_ref, bqkv_ref, wo_ref, w1_ref, b1_ref, w2_ref,
                         vec_ref, o_ref, *, num_heads, num_layers, seq_len):
    L, D = pe_ref.shape
    dh = D // num_heads

    # encode_inputs: positional encoding + input LayerNorm (all f32)
    enc = encln_ref[...]                                   # (2, D): gamma | beta
    x = _layernorm(x_ref[0] + pe_ref[...], enc[0:1], enc[1:2])
    mask = mask_ref[...]                                   # (L, L) additive mask

    for l in range(num_layers):                            # unrolled; weights in VMEM
        vec = vec_ref[l]                                   # (8,D): bo|ln1w|ln1b|b2|ln2w|ln2b|0|0
        bqkv = bqkv_ref[l]                                 # (1, 3D) f32

        # ---- fused QKV projection: one lane-dense (L, 3D) matmul ----------
        qkv = jnp.dot(x.astype(jnp.bfloat16), wqkv_ref[l],
                      preferred_element_type=jnp.float32) + bqkv     # (L, 3D) f32
        qkvb = qkv.astype(jnp.bfloat16)

        # ---- attention, per-head via static lane slices --------------------
        # (dh=8-deep score/context matmuls are MXU-cheap at these sizes; the
        #  win was removing the broadcast + 12 tiny projection matmuls above.)
        ctx_heads = []
        for h in range(num_heads):
            qh = qkvb[:, h * dh:(h + 1) * dh]              # (L, dh); 1/sqrt(dh) pre-folded
            kh = qkvb[:, D + h * dh:D + (h + 1) * dh]
            vh = qkvb[:, 2 * D + h * dh:2 * D + (h + 1) * dh]
            s = jnp.einsum('qd,kd->qk', qh, kh,
                           preferred_element_type=jnp.float32) + mask  # (L, L) f32
            m = jnp.max(s, axis=-1, keepdims=True)
            p = jnp.exp(s - m)
            p = p * pl.reciprocal(jnp.sum(p, axis=-1, keepdims=True), approx=True)
            ctx_heads.append(jnp.dot(p.astype(jnp.bfloat16), vh,
                                     preferred_element_type=jnp.float32))  # (L, dh)
        ctx = jnp.concatenate(ctx_heads, axis=-1)          # (L, D), torch head layout

        # ---- output projection: single depth-D matmul ----------------------
        attn = jnp.dot(ctx.astype(jnp.bfloat16), wo_ref[l],
                       preferred_element_type=jnp.float32) + vec[0:1]
        x = _layernorm(x + attn, vec[1:2], vec[2:3])

        # ---- feed-forward (relu), elementwise in f32 ------------------------
        h1 = jnp.maximum(
            jnp.dot(x.astype(jnp.bfloat16), w1_ref[l],
                    preferred_element_type=jnp.float32) + b1_ref[l], 0.0)
        ff = jnp.dot(h1.astype(jnp.bfloat16), w2_ref[l],
                     preferred_element_type=jnp.float32) + vec[3:4]
        x = _layernorm(x + ff, vec[4:5], vec[5:6])

    # only the frames slice goes back to HBM, one contiguous store
    o_ref[0] = x[:seq_len, :]


# ---------------------------------------------------------------------------
# Host-side constant builders (positional encoding, attention mask)
# ---------------------------------------------------------------------------
def _make_pos_enc_np(seq_len, d_model):
    """PosEncoding buffer, already divided by sqrt(d_model)."""
    pos = np.arange(seq_len, dtype=np.float32)[:, None]
    div = np.exp(np.arange(0, d_model, 2, dtype=np.float32)
                 * (-math.log(10000.0) / d_model))
    pe = np.zeros((seq_len, d_model), np.float32)
    pe[:, 0::2] = np.sin(pos * div)
    pe[:, 1::2] = np.cos(pos * div)
    return (pe / math.sqrt(d_model)).astype(np.float32)


def _make_mask_1st_np(seq_len, n_blocks, neg=NEG_INF):
    """generate_attention_mask_1st: strict-causal (triu, k=1 -> neg), tiled."""
    tri = np.triu(np.ones((seq_len, seq_len), np.float32), k=1)
    base = np.where(tri == 1.0, np.float32(neg), np.float32(0.0))
    return np.tile(base, (n_blocks, n_blocks)).astype(np.float32)   # (L, L)


# ---------------------------------------------------------------------------
# Host-side weight preparation: pre-transpose, fuse QKV, pack small vectors.
# ---------------------------------------------------------------------------
def _prepare_operands(params, num_heads, mxu_dtype=jnp.bfloat16):
    layers = params['layers']
    D = layers[0]['w_out'].shape[0]
    dh = D // num_heads
    scale = 1.0 / math.sqrt(dh)
    # fold 1/sqrt(dh) into the query rows of the fused in-projection
    qscale = jnp.concatenate([jnp.full((D,), scale, jnp.float32),
                              jnp.ones((2 * D,), jnp.float32)])      # (3D,)

    def stack(fn):
        return jnp.stack([fn(p) for p in layers], axis=0)

    WQKV = stack(lambda p: (p['w_in'] * qscale[:, None]).T.astype(mxu_dtype))  # (D, 3D)
    BQKV = stack(lambda p: (p['b_in'][0] * qscale).reshape(1, 3 * D))          # (1, 3D) f32
    WO = stack(lambda p: p['w_out'].T.astype(mxu_dtype))                       # (D, D)
    W1 = stack(lambda p: p['w1'].T.astype(mxu_dtype))                          # (D, FF)
    B1 = stack(lambda p: p['b1'].reshape(1, -1))                               # (1, FF) f32
    W2 = stack(lambda p: p['w2'].T.astype(mxu_dtype))                          # (FF, D)
    VEC = stack(lambda p: jnp.concatenate(
        [p['b_out'], p['ln1_w'], p['ln1_b'],
         p['b2'], p['ln2_w'], p['ln2_b'],
         jnp.zeros((2, D), jnp.float32)], axis=0))                             # (8, D) f32
    ENCLN = jnp.concatenate([params['enc_ln_w'], params['enc_ln_b']], axis=0)  # (2, D)
    return ENCLN, WQKV, BQKV, WO, W1, B1, W2, VEC


# ---------------------------------------------------------------------------
# Wrappers
# ---------------------------------------------------------------------------
@functools.partial(jax.jit, static_argnums=(3,))
def encoder_vl_forward_pallas(emb_frames, emb_actions, params, num_heads):
    B, S, D = emb_frames.shape
    n_blocks = 1 + len(emb_actions)
    L = n_blocks * S
    FF = params['layers'][0]['w1'].shape[0]
    num_layers = len(params['layers'])

    pe = jnp.asarray(np.tile(_make_pos_enc_np(S, D), (n_blocks, 1)))   # (L, D)
    mask = jnp.asarray(_make_mask_1st_np(S, n_blocks))                 # (L, L)

    x = jnp.concatenate([emb_frames] + list(emb_actions),
                        axis=1).astype(jnp.float32)                    # (B, L, D)

    encln, wqkv, bqkv, wo, w1, b1, w2, vec = _prepare_operands(params, num_heads)

    kernel = functools.partial(fused_encoder_kernel, num_heads=num_heads,
                               num_layers=num_layers, seq_len=S)

    const2 = lambda b: (0, 0)
    const3 = lambda b: (0, 0, 0)

    return pl.pallas_call(
        kernel,
        out_shape=jax.ShapeDtypeStruct((B, S, D), jnp.float32),
        grid=(B,),
        in_specs=[
            pl.BlockSpec((1, L, D), lambda b: (b, 0, 0)),             # x, per batch
            pl.BlockSpec((L, D), const2),                             # PE (shared)
            pl.BlockSpec((L, L), const2),                             # mask (shared)
            pl.BlockSpec((2, D), const2),                             # enc LayerNorm
            pl.BlockSpec((num_layers, D, 3 * D), const3),             # fused QKV W (bf16)
            pl.BlockSpec((num_layers, 1, 3 * D), const3),             # fused QKV b (f32)
            pl.BlockSpec((num_layers, D, D), const3),                 # out-proj W (bf16)
            pl.BlockSpec((num_layers, D, FF), const3),                # FFN W1 (bf16)
            pl.BlockSpec((num_layers, 1, FF), const3),                # FFN b1 (f32)
            pl.BlockSpec((num_layers, FF, D), const3),                # FFN W2 (bf16)
            pl.BlockSpec((num_layers, 8, D), const3),                 # packed per-layer vecs
        ],
        out_specs=pl.BlockSpec((1, S, D), lambda b: (b, 0, 0)),
        compiler_params=pltpu.CompilerParams(
            dimension_semantics=("parallel",)),
    )(x, pe, mask, encln, wqkv, bqkv, wo, w1, b1, w2, vec)


def transition_learner_forward(emb_frames, actions, act_emb_tables, params, num_heads):
    """TransitionLearner.forward: embed_actions (nn.Embedding) + EncoderVL."""
    # nn.Embedding lookup = plain JAX gather (tiny; not worth a Pallas kernel).
    emb_actions = [act_emb_tables[i][actions[i]] for i in range(len(actions))]
    # TODO(synk): test_step / update_query stateful query buffers are host-side
    # Python bookkeeping on the module, not implemented here.
    return encoder_vl_forward_pallas(emb_frames, emb_actions, params, num_heads)


# ---------------------------------------------------------------------------
# Pure-JAX reference (PyTorch-layout weights) for the correctness check.
# ---------------------------------------------------------------------------
def reference_forward(emb_frames, emb_actions, params, num_heads):
    B, S, D = emb_frames.shape
    n = 1 + len(emb_actions)
    L = n * S
    dh = D // num_heads
    pe = jnp.asarray(np.tile(_make_pos_enc_np(S, D), (n, 1)))
    x = jnp.concatenate([emb_frames] + list(emb_actions), axis=1) + pe[None]
    x = _layernorm(x, params['enc_ln_w'][None], params['enc_ln_b'][None])
    mask = jnp.asarray(_make_mask_1st_np(S, n, neg=-np.inf))
    for p in params['layers']:
        qkv = x @ p['w_in'].T + p['b_in'][None]
        q, k, v = qkv[..., :D], qkv[..., D:2 * D], qkv[..., 2 * D:]
        q = q.reshape(B, L, num_heads, dh).transpose(0, 2, 1, 3)
        k = k.reshape(B, L, num_heads, dh).transpose(0, 2, 1, 3)
        v = v.reshape(B, L, num_heads, dh).transpose(0, 2, 1, 3)
        s = jnp.einsum('bhld,bhmd->bhlm', q, k) / math.sqrt(dh) + mask
        a = jax.nn.softmax(s, axis=-1)
        ctx = jnp.einsum('bhlm,bhmd->bhld', a, v).transpose(0, 2, 1, 3).reshape(B, L, D)
        attn = ctx @ p['w_out'].T + p['b_out'][None]
        x = _layernorm(x + attn, p['ln1_w'][None], p['ln1_b'][None])
        h = jax.nn.relu(x @ p['w1'].T + p['b1'][None])
        ffo = h @ p['w2'].T + p['b2'][None]
        x = _layernorm(x + ffo, p['ln2_w'][None], p['ln2_b'][None])
    return x[:, :S, :]


def init_params(key, d_model, ff_dim, n_layers):
    def nrm(k, shape, scale=0.05):
        return scale * jax.random.normal(k, shape, jnp.float32)

    keys = iter(jax.random.split(key, 1 + n_layers * 8))
    params = {
        'enc_ln_w': jnp.ones((1, d_model), jnp.float32),
        'enc_ln_b': jnp.zeros((1, d_model), jnp.float32),
        'layers': [],
    }
    for _ in range(n_layers):
        params['layers'].append({
            'w_in':  nrm(next(keys), (3 * d_model, d_model)),
            'b_in':  nrm(next(keys), (1, 3 * d_model), 0.02),
            'w_out': nrm(next(keys), (d_model, d_model)),
            'b_out': nrm(next(keys), (1, d_model), 0.02),
            'ln1_w': jnp.ones((1, d_model), jnp.float32),
            'ln1_b': jnp.zeros((1, d_model), jnp.float32),
            'w1':    nrm(next(keys), (ff_dim, d_model)),
            'b1':    nrm(next(keys), (1, ff_dim), 0.02),
            'w2':    nrm(next(keys), (d_model, ff_dim)),
            'b2':    nrm(next(keys), (1, d_model), 0.02),
            'ln2_w': jnp.ones((1, d_model), jnp.float32),
            'ln2_b': jnp.zeros((1, d_model), jnp.float32),
        })
    return params


if __name__ == "__main__":
    # args: hidden_dim=32, transenc_heads=4, ff_dim=64, num_transenclayer=2,
    #       pos_enc_type='original', attn_mask_type='1st', num_agents=2,
    #       max_seq_len = frame_seq_len = 8, discrete action_space=10,
    #       all dropout ratios = 0 (inference)
    B, S, D, H, FF, NLAYERS, NAGENTS, ASPACE = 2, 8, 32, 4, 64, 2, 2, 10

    key = jax.random.PRNGKey(0)
    k_f, k_a, k_p, k_e = jax.random.split(key, 4)
    emb_frames = jax.random.normal(k_f, (B, S, D), jnp.float32)
    a_keys = jax.random.split(k_a, NAGENTS)
    actions = [jax.random.randint(a_keys[i], (B, S), 0, ASPACE) for i in range(NAGENTS)]
    e_keys = jax.random.split(k_e, NAGENTS)
    act_emb_tables = [jax.random.uniform(e_keys[i], (ASPACE, D), jnp.float32, -0.1, 0.1)
                      for i in range(NAGENTS)]
    params = init_params(k_p, D, FF, NLAYERS)

    out = transition_learner_forward(emb_frames, actions, act_emb_tables, params, H)
    out = jax.block_until_ready(out)
    assert out.shape == (B, S, D)

    # pure-JAX f32 reference check (same params, PyTorch layout).
    # Kernel uses bf16 MXU operands with f32 accumulation -> tolerance 3e-2.
    emb_actions = [act_emb_tables[i][actions[i]] for i in range(NAGENTS)]
    ref = reference_forward(emb_frames, emb_actions, params, H)
    np.testing.assert_allclose(np.asarray(out), np.asarray(ref), atol=3e-2, rtol=3e-2)

    print("KERNEL_OK")
</pallas_src>

<mosaic_0001>
module attributes {stable_mosaic.version = 11 : i64} {
  func.func @fused_encoder_kernel(%arg0: i32, %arg1: memref<1x24x32xf32, #tpu.memory_space<vmem>>, %arg2: memref<24x32xf32, #tpu.memory_space<vmem>>, %arg3: memref<24x24xf32, #tpu.memory_space<vmem>>, %arg4: memref<2x32xf32, #tpu.memory_space<vmem>>, %arg5: memref<2x32x96xbf16, #tpu.memory_space<vmem>>, %arg6: memref<2x1x96xf32, #tpu.memory_space<vmem>>, %arg7: memref<2x32x32xbf16, #tpu.memory_space<vmem>>, %arg8: memref<2x32x64xbf16, #tpu.memory_space<vmem>>, %arg9: memref<2x1x64xf32, #tpu.memory_space<vmem>>, %arg10: memref<2x64x32xbf16, #tpu.memory_space<vmem>>, %arg11: memref<2x8x32xf32, #tpu.memory_space<vmem>>, %arg12: memref<1x8x32xf32, #tpu.memory_space<vmem>>) attributes {dimension_semantics = [#tpu.dimension_semantics<parallel>], iteration_bounds = array<i64: 2>, scalar_prefetch = 0 : i64, scratch_operands = 0 : i64, tpu.core_type = #tpu.core_type<tc>, window_params = [{transform_indices = @transform_0, window_bounds = array<i64: 1, 24, 32>}, {pipeline_mode = #tpu.pipeline_mode<synchronous>, transform_indices = @transform_1, window_bounds = array<i64: 24, 32>}, {pipeline_mode = #tpu.pipeline_mode<synchronous>, transform_indices = @transform_2, window_bounds = array<i64: 24, 24>}, {pipeline_mode = #tpu.pipeline_mode<synchronous>, transform_indices = @transform_3, window_bounds = array<i64: 2, 32>}, {pipeline_mode = #tpu.pipeline_mode<synchronous>, transform_indices = @transform_4, window_bounds = array<i64: 2, 32, 96>}, {pipeline_mode = #tpu.pipeline_mode<synchronous>, transform_indices = @transform_5, window_bounds = array<i64: 2, 1, 96>}, {pipeline_mode = #tpu.pipeline_mode<synchronous>, transform_indices = @transform_6, window_bounds = array<i64: 2, 32, 32>}, {pipeline_mode = #tpu.pipeline_mode<synchronous>, transform_indices = @transform_7, window_bounds = array<i64: 2, 32, 64>}, {pipeline_mode = #tpu.pipeline_mode<synchronous>, transform_indices = @transform_8, window_bounds = array<i64: 2, 1, 64>}, {pipeline_mode = #tpu.pipeline_mode<synchronous>, transform_indices = @transform_9, window_bounds = array<i64: 2, 64, 32>}, {pipeline_mode = #tpu.pipeline_mode<synchronous>, transform_indices = @transform_10, window_bounds = array<i64: 2, 8, 32>}, {transform_indices = @transform_11, window_bounds = array<i64: 1, 8, 32>}]} {
    %c0 = arith.constant 0 : index
    %c0_0 = arith.constant 0 : index
    %0 = vector.load %arg4[%c0, %c0_0] : memref<2x32xf32, #tpu.memory_space<vmem>>, vector<2x32xf32>
    %c0_1 = arith.constant 0 : index
    %c0_2 = arith.constant 0 : index
    %c0_3 = arith.constant 0 : index
    %1 = vector.load %arg1[%c0_1, %c0_2, %c0_3] : memref<1x24x32xf32, #tpu.memory_space<vmem>>, vector<1x24x32xf32>
    %2 = vector.shape_cast %1 : vector<1x24x32xf32> to vector<24x32xf32>
    %c0_4 = arith.constant 0 : index
    %c0_5 = arith.constant 0 : index
    %3 = vector.load %arg2[%c0_4, %c0_5] : memref<24x32xf32, #tpu.memory_space<vmem>>, vector<24x32xf32>
    %4 = arith.addf %2, %3 : vector<24x32xf32>
    %5 = vector.extract_strided_slice %0 {offsets = [0, 0], sizes = [1, 32], strides = [1, 1]} : vector<2x32xf32> to vector<1x32xf32>
    %6 = vector.extract_strided_slice %0 {offsets = [1, 0], sizes = [1, 32], strides = [1, 1]} : vector<2x32xf32> to vector<1x32xf32>
    %cst = arith.constant dense<0.000000e+00> : vector<24xf32>
    %7 = vector.multi_reduction <add>, %4, %cst [1] : vector<24x32xf32> to vector<24xf32>
    %8 = vector.shape_cast %7 : vector<24xf32> to vector<24x1xf32>
    %cst_6 = arith.constant 3.200000e+01 : f32
    %9 = vector.broadcast %cst_6 : f32 to vector<24x1xf32>
    %10 = arith.divf %8, %9 : vector<24x1xf32>
    %11 = vector.broadcast %10 : vector<24x1xf32> to vector<24x32xf32>
    %12 = arith.subf %4, %11 : vector<24x32xf32>
    %13 = arith.mulf %12, %12 : vector<24x32xf32>
    %cst_7 = arith.constant dense<0.000000e+00> : vector<24xf32>
    %14 = vector.multi_reduction <add>, %13, %cst_7 [1] : vector<24x32xf32> to vector<24xf32>
    %15 = vector.shape_cast %14 : vector<24xf32> to vector<24x1xf32>
    %cst_8 = arith.constant 3.200000e+01 : f32
    %16 = vector.broadcast %cst_8 : f32 to vector<24x1xf32>
    %17 = arith.divf %15, %16 : vector<24x1xf32>
    %18 = vector.broadcast %10 : vector<24x1xf32> to vector<24x32xf32>
    %19 = arith.subf %4, %18 : vector<24x32xf32>
    %cst_9 = arith.constant 9.99999974E-6 : f32
    %20 = vector.broadcast %cst_9 : f32 to vector<24x1xf32>
    %21 = arith.addf %17, %20 : vector<24x1xf32>
    %22 = math.rsqrt %21 : vector<24x1xf32>
    %23 = vector.broadcast %22 : vector<24x1xf32> to vector<24x32xf32>
    %24 = arith.mulf %19, %23 : vector<24x32xf32>
    %25 = vector.broadcast %5 : vector<1x32xf32> to vector<24x32xf32>
    %26 = arith.mulf %24, %25 : vector<24x32xf32>
    %27 = vector.broadcast %6 : vector<1x32xf32> to vector<24x32xf32>
    %28 = arith.addf %26, %27 : vector<24x32xf32>
    %c0_10 = arith.constant 0 : index
    %c0_11 = arith.constant 0 : index
    %29 = vector.load %arg3[%c0_10, %c0_11] : memref<24x24xf32, #tpu.memory_space<vmem>>, vector<24x24xf32>
    %c0_12 = arith.constant 0 : index
    %c0_13 = arith.constant 0 : index
    %c0_14 = arith.constant 0 : index
    %30 = vector.load %arg11[%c0_12, %c0_13, %c0_14] : memref<2x8x32xf32, #tpu.memory_space<vmem>>, vector<1x8x32xf32>
    %31 = vector.shape_cast %30 : vector<1x8x32xf32> to vector<8x32xf32>
    %c0_15 = arith.constant 0 : index
    %c0_16 = arith.constant 0 : index
    %c0_17 = arith.constant 0 : index
    %32 = vector.load %arg6[%c0_15, %c0_16, %c0_17] : memref<2x1x96xf32, #tpu.memory_space<vmem>>, vector<1x1x96xf32>
    %33 = vector.shape_cast %32 : vector<1x1x96xf32> to vector<1x96xf32>
    %34 = arith.truncf %28 : vector<24x32xf32> to vector<24x32xbf16>
    %c0_18 = arith.constant 0 : index
    %c0_19 = arith.constant 0 : index
    %c0_20 = arith.constant 0 : index
    %35 = vector.load %arg5[%c0_18, %c0_19, %c0_20] : memref<2x32x96xbf16, #tpu.memory_space<vmem>>, vector<1x32x96xbf16>
    %36 = vector.shape_cast %35 : vector<1x32x96xbf16> to vector<32x96xbf16>
    %cst_21 = arith.constant dense<0.000000e+00> : vector<24x96xf32>
    %37 = tpu.matmul %34, %36, %cst_21 {dimension_numbers = #tpu.dot_dimension_numbers<[1], [0], [0], [1], [0, 0, 1, 1], [], []>} : vector<24x32xbf16>, vector<32x96xbf16>, vector<24x96xf32> -> vector<24x96xf32>
    %38 = vector.broadcast %33 : vector<1x96xf32> to vector<24x96xf32>
    %39 = arith.addf %37, %38 : vector<24x96xf32>
    %40 = arith.truncf %39 : vector<24x96xf32> to vector<24x96xbf16>
    %41 = vector.extract_strided_slice %40 {offsets = [0, 0], sizes = [24, 8], strides = [1, 1]} : vector<24x96xbf16> to vector<24x8xbf16>
    %42 = vector.extract_strided_slice %40 {offsets = [0, 32], sizes = [24, 8], strides = [1, 1]} : vector<24x96xbf16> to vector<24x8xbf16>
    %43 = vector.extract_strided_slice %40 {offsets = [0, 64], sizes = [24, 8], strides = [1, 1]} : vector<24x96xbf16> to vector<24x8xbf16>
    "tpu.trace_start"() <{level = 10 : i32, message = "qd,kd->qk"}> : () -> ()
    %cst_22 = arith.constant dense<0.000000e+00> : vector<24x24xf32>
    %44 = tpu.matmul %41, %42, %cst_22 {dimension_numbers = #tpu.dot_dimension_numbers<[1], [1], [0], [0], [0, 0, 1, 0], [], []>} : vector<24x8xbf16>, vector<24x8xbf16>, vector<24x24xf32> -> vector<24x24xf32>
    "tpu.trace_stop"() : () -> ()
    %45 = arith.addf %44, %29 : vector<24x24xf32>
    %cst_23 = arith.constant dense<0xFF800000> : vector<24xf32>
    %46 = vector.multi_reduction <maximumf>, %45, %cst_23 [1] : vector<24x24xf32> to vector<24xf32>
    %47 = vector.shape_cast %46 : vector<24xf32> to vector<24x1xf32>
    %48 = vector.broadcast %47 : vector<24x1xf32> to vector<24x24xf32>
    %49 = arith.subf %45, %48 : vector<24x24xf32>
    %50 = math.exp %49 : vector<24x24xf32>
    %cst_24 = arith.constant dense<0.000000e+00> : vector<24xf32>
    %51 = vector.multi_reduction <add>, %50, %cst_24 [1] : vector<24x24xf32> to vector<24xf32>
    %52 = vector.shape_cast %51 : vector<24xf32> to vector<24x1xf32>
    %53 = tpu.reciprocal %52 {approx = true} : vector<24x1xf32> -> vector<24x1xf32>
    %54 = vector.broadcast %53 : vector<24x1xf32> to vector<24x24xf32>
    %55 = arith.mulf %50, %54 : vector<24x24xf32>
    %56 = arith.truncf %55 : vector<24x24xf32> to vector<24x24xbf16>
    %cst_25 = arith.constant dense<0.000000e+00> : vector<24x8xf32>
    %57 = tpu.matmul %56, %43, %cst_25 {dimension_numbers = #tpu.dot_dimension_numbers<[1], [0], [0], [1], [0, 0, 1, 1], [], []>} : vector<24x24xbf16>, vector<24x8xbf16>, vector<24x8xf32> -> vector<24x8xf32>
    %58 = vector.extract_strided_slice %40 {offsets = [0, 8], sizes = [24, 8], strides = [1, 1]} : vector<24x96xbf16> to vector<24x8xbf16>
    %59 = vector.extract_strided_slice %40 {offsets = [0, 40], sizes = [24, 8], strides = [1, 1]} : vector<24x96xbf16> to vector<24x8xbf16>
    %60 = vector.extract_strided_slice %40 {offsets = [0, 72], sizes = [24, 8], strides = [1, 1]} : vector<24x96xbf16> to vector<24x8xbf16>
    "tpu.trace_start"() <{level = 10 : i32, message = "qd,kd->qk"}> : () -> ()
    %cst_26 = arith.constant dense<0.000000e+00> : vector<24x24xf32>
    %61 = tpu.matmul %58, %59, %cst_26 {dimension_numbers = #tpu.dot_dimension_numbers<[1], [1], [0], [0], [0, 0, 1, 0], [], []>} : vector<24x8xbf16>, vector<24x8xbf16>, vector<24x24xf32> -> vector<24x24xf32>
    "tpu.trace_stop"() : () -> ()
    %62 = arith.addf %61, %29 : vector<24x24xf32>
    %cst_27 = arith.constant dense<0xFF800000> : vector<24xf32>
    %63 = vector.multi_reduction <maximumf>, %62, %cst_27 [1] : vector<24x24xf32> to vector<24xf32>
    %64 = vector.shape_cast %63 : vector<24xf32> to vector<24x1xf32>
    %65 = vector.broadcast %64 : vector<24x1xf32> to vector<24x24xf32>
    %66 = arith.subf %62, %65 : vector<24x24xf32>
    %67 = math.exp %66 : vector<24x24xf32>
    %cst_28 = arith.constant dense<0.000000e+00> : vector<24xf32>
    %68 = vector.multi_reduction <add>, %67, %cst_28 [1] : vector<24x24xf32> to vector<24xf32>
    %69 = vector.shape_cast %68 : vector<24xf32> to vector<24x1xf32>
    %70 = tpu.reciprocal %69 {approx = true} : vector<24x1xf32> -> vector<24x1xf32>
    %71 = vector.broadcast %70 : vector<24x1xf32> to vector<24x24xf32>
    %72 = arith.mulf %67, %71 : vector<24x24xf32>
    %73 = arith.truncf %72 : vector<24x24xf32> to vector<24x24xbf16>
    %cst_29 = arith.constant dense<0.000000e+00> : vector<24x8xf32>
    %74 = tpu.matmul %73, %60, %cst_29 {dimension_numbers = #tpu.dot_dimension_numbers<[1], [0], [0], [1], [0, 0, 1, 1], [], []>} : vector<24x24xbf16>, vector<24x8xbf16>, vector<24x8xf32> -> vector<24x8xf32>
    %75 = vector.extract_strided_slice %40 {offsets = [0, 16], sizes = [24, 8], strides = [1, 1]} : vector<24x96xbf16> to vector<24x8xbf16>
    %76 = vector.extract_strided_slice %40 {offsets = [0, 48], sizes = [24, 8], strides = [1, 1]} : vector<24x96xbf16> to vector<24x8xbf16>
    %77 = vector.extract_strided_slice %40 {offsets = [0, 80], sizes = [24, 8], strides = [1, 1]} : vector<24x96xbf16> to vector<24x8xbf16>
    "tpu.trace_start"() <{level = 10 : i32, message = "qd,kd->qk"}> : () -> ()
    %cst_30 = arith.constant dense<0.000000e+00> : vector<24x24xf32>
    %78 = tpu.matmul %75, %76, %cst_30 {dimension_numbers = #tpu.dot_dimension_numbers<[1], [1], [0], [0], [0, 0, 1, 0], [], []>} : vector<24x8xbf16>, vector<24x8xbf16>, vector<24x24xf32> -> vector<24x24xf32>
    "tpu.trace_stop"() : () -> ()
    %79 = arith.addf %78, %29 : vector<24x24xf32>
    %cst_31 = arith.constant dense<0xFF800000> : vector<24xf32>
    %80 = vector.multi_reduction <maximumf>, %79, %cst_31 [1] : vector<24x24xf32> to vector<24xf32>
    %81 = vector.shape_cast %80 : vector<24xf32> to vector<24x1xf32>
    %82 = vector.broadcast %81 : vector<24x1xf32> to vector<24x24xf32>
    %83 = arith.subf %79, %82 : vector<24x24xf32>
    %84 = math.exp %83 : vector<24x24xf32>
    %cst_32 = arith.constant dense<0.000000e+00> : vector<24xf32>
    %85 = vector.multi_reduction <add>, %84, %cst_32 [1] : vector<24x24xf32> to vector<24xf32>
    %86 = vector.shape_cast %85 : vector<24xf32> to vector<24x1xf32>
    %87 = tpu.reciprocal %86 {approx = true} : vector<24x1xf32> -> vector<24x1xf32>
    %88 = vector.broadcast %87 : vector<24x1xf32> to vector<24x24xf32>
    %89 = arith.mulf %84, %88 : vector<24x24xf32>
    %90 = arith.truncf %89 : vector<24x24xf32> to vector<24x24xbf16>
    %cst_33 = arith.constant dense<0.000000e+00> : vector<24x8xf32>
    %91 = tpu.matmul %90, %77, %cst_33 {dimension_numbers = #tpu.dot_dimension_numbers<[1], [0], [0], [1], [0, 0, 1, 1], [], []>} : vector<24x24xbf16>, vector<24x8xbf16>, vector<24x8xf32> -> vector<24x8xf32>
    %92 = vector.extract_strided_slice %40 {offsets = [0, 24], sizes = [24, 8], strides = [1, 1]} : vector<24x96xbf16> to vector<24x8xbf16>
    %93 = vector.extract_strided_slice %40 {offsets = [0, 56], sizes = [24, 8], strides = [1, 1]} : vector<24x96xbf16> to vector<24x8xbf16>
    %94 = vector.extract_strided_slice %40 {offsets = [0, 88], sizes = [24, 8], strides = [1, 1]} : vector<24x96xbf16> to vector<24x8xbf16>
    "tpu.trace_start"() <{level = 10 : i32, message = "qd,kd->qk"}> : () -> ()
    %cst_34 = arith.constant dense<0.000000e+00> : vector<24x24xf32>
    %95 = tpu.matmul %92, %93, %cst_34 {dimension_numbers = #tpu.dot_dimension_numbers<[1], [1], [0], [0], [0, 0, 1, 0], [], []>} : vector<24x8xbf16>, vector<24x8xbf16>, vector<24x24xf32> -> vector<24x24xf32>
    "tpu.trace_stop"() : () -> ()
    %96 = arith.addf %95, %29 : vector<24x24xf32>
    %cst_35 = arith.constant dense<0xFF800000> : vector<24xf32>
    %97 = vector.multi_reduction <maximumf>, %96, %cst_35 [1] : vector<24x24xf32> to vector<24xf32>
    %98 = vector.shape_cast %97 : vector<24xf32> to vector<24x1xf32>
    %99 = vector.broadcast %98 : vector<24x1xf32> to vector<24x24xf32>
    %100 = arith.subf %96, %99 : vector<24x24xf32>
    %101 = math.exp %100 : vector<24x24xf32>
    %cst_36 = arith.constant dense<0.000000e+00> : vector<24xf32>
    %102 = vector.multi_reduction <add>, %101, %cst_36 [1] : vector<24x24xf32> to vector<24xf32>
    %103 = vector.shape_cast %102 : vector<24xf32> to vector<24x1xf32>
    %104 = tpu.reciprocal %103 {approx = true} : vector<24x1xf32> -> vector<24x1xf32>
    %105 = vector.broadcast %104 : vector<24x1xf32> to vector<24x24xf32>
    %106 = arith.mulf %101, %105 : vector<24x24xf32>
    %107 = arith.truncf %106 : vector<24x24xf32> to vector<24x24xbf16>
    %cst_37 = arith.constant dense<0.000000e+00> : vector<24x8xf32>
    %108 = tpu.matmul %107, %94, %cst_37 {dimension_numbers = #tpu.dot_dimension_numbers<[1], [0], [0], [1], [0, 0, 1, 1], [], []>} : vector<24x24xbf16>, vector<24x8xbf16>, vector<24x8xf32> -> vector<24x8xf32>
    %109 = tpu.concatenate %57, %74, %91, %108 in 1 : vector<24x8xf32>, vector<24x8xf32>, vector<24x8xf32>, vector<24x8xf32> -> vector<24x32xf32>
    %110 = arith.truncf %109 : vector<24x32xf32> to vector<24x32xbf16>
    %c0_38 = arith.constant 0 : index
    %c0_39 = arith.constant 0 : index
    %c0_40 = arith.constant 0 : index
    %111 = vector.load %arg7[%c0_38, %c0_39, %c0_40] : memref<2x32x32xbf16, #tpu.memory_space<vmem>>, vector<1x32x32xbf16>
    %112 = vector.shape_cast %111 : vector<1x32x32xbf16> to vector<32x32xbf16>
    %cst_41 = arith.constant dense<0.000000e+00> : vector<24x32xf32>
    %113 = tpu.matmul %110, %112, %cst_41 {dimension_numbers = #tpu.dot_dimension_numbers<[1], [0], [0], [1], [0, 0, 1, 1], [], []>} : vector<24x32xbf16>, vector<32x32xbf16>, vector<24x32xf32> -> vector<24x32xf32>
    %114 = vector.extract_strided_slice %31 {offsets = [0, 0], sizes = [1, 32], strides = [1, 1]} : vector<8x32xf32> to vector<1x32xf32>
    %115 = vector.broadcast %114 : vector<1x32xf32> to vector<24x32xf32>
    %116 = arith.addf %113, %115 : vector<24x32xf32>
    %117 = arith.addf %28, %116 : vector<24x32xf32>
    %118 = vector.extract_strided_slice %31 {offsets = [1, 0], sizes = [1, 32], strides = [1, 1]} : vector<8x32xf32> to vector<1x32xf32>
    %119 = vector.extract_strided_slice %31 {offsets = [2, 0], sizes = [1, 32], strides = [1, 1]} : vector<8x32xf32> to vector<1x32xf32>
    %cst_42 = arith.constant dense<0.000000e+00> : vector<24xf32>
    %120 = vector.multi_reduction <add>, %117, %cst_42 [1] : vector<24x32xf32> to vector<24xf32>
    %121 = vector.shape_cast %120 : vector<24xf32> to vector<24x1xf32>
    %cst_43 = arith.constant 3.200000e+01 : f32
    %122 = vector.broadcast %cst_43 : f32 to vector<24x1xf32>
    %123 = arith.divf %121, %122 : vector<24x1xf32>
    %124 = vector.broadcast %123 : vector<24x1xf32> to vector<24x32xf32>
    %125 = arith.subf %117, %124 : vector<24x32xf32>
    %126 = arith.mulf %125, %125 : vector<24x32xf32>
    %cst_44 = arith.constant dense<0.000000e+00> : vector<24xf32>
    %127 = vector.multi_reduction <add>, %126, %cst_44 [1] : vector<24x32xf32> to vector<24xf32>
    %128 = vector.shape_cast %127 : vector<24xf32> to vector<24x1xf32>
    %cst_45 = arith.constant 3.200000e+01 : f32
    %129 = vector.broadcast %cst_45 : f32 to vector<24x1xf32>
    %130 = arith.divf %128, %129 : vector<24x1xf32>
    %131 = vector.broadcast %123 : vector<24x1xf32> to vector<24x32xf32>
    %132 = arith.subf %117, %131 : vector<24x32xf32>
    %cst_46 = arith.constant 9.99999974E-6 : f32
    %133 = vector.broadcast %cst_46 : f32 to vector<24x1xf32>
    %134 = arith.addf %130, %133 : vector<24x1xf32>
    %135 = math.rsqrt %134 : vector<24x1xf32>
    %136 = vector.broadcast %135 : vector<24x1xf32> to vector<24x32xf32>
    %137 = arith.mulf %132, %136 : vector<24x32xf32>
    %138 = vector.broadcast %118 : vector<1x32xf32> to vector<24x32xf32>
    %139 = arith.mulf %137, %138 : vector<24x32xf32>
    %140 = vector.broadcast %119 : vector<1x32xf32> to vector<24x32xf32>
    %141 = arith.addf %139, %140 : vector<24x32xf32>
    %142 = arith.truncf %141 : vector<24x32xf32> to vector<24x32xbf16>
    %c0_47 = arith.constant 0 : index
    %c0_48 = arith.constant 0 : index
    %c0_49 = arith.constant 0 : index
    %143 = vector.load %arg8[%c0_47, %c0_48, %c0_49] : memref<2x32x64xbf16, #tpu.memory_space<vmem>>, vector<1x32x64xbf16>
    %144 = vector.shape_cast %143 : vector<1x32x64xbf16> to vector<32x64xbf16>
    %cst_50 = arith.constant dense<0.000000e+00> : vector<24x64xf32>
    %145 = tpu.matmul %142, %144, %cst_50 {dimension_numbers = #tpu.dot_dimension_numbers<[1], [0], [0], [1], [0, 0, 1, 1], [], []>} : vector<24x32xbf16>, vector<32x64xbf16>, vector<24x64xf32> -> vector<24x64xf32>
    %c0_51 = arith.constant 0 : index
    %c0_52 = arith.constant 0 : index
    %c0_53 = arith.constant 0 : index
    %146 = vector.load %arg9[%c0_51, %c0_52, %c0_53] : memref<2x1x64xf32, #tpu.memory_space<vmem>>, vector<1x1x64xf32>
    %147 = vector.shape_cast %146 : vector<1x1x64xf32> to vector<1x64xf32>
    %148 = vector.broadcast %147 : vector<1x64xf32> to vector<24x64xf32>
    %149 = arith.addf %145, %148 : vector<24x64xf32>
    %cst_54 = arith.constant 0.000000e+00 : f32
    %150 = vector.broadcast %cst_54 : f32 to vector<24x64xf32>
    %151 = arith.maximumf %149, %150 : vector<24x64xf32>
    %152 = arith.truncf %151 : vector<24x64xf32> to vector<24x64xbf16>
    %c0_55 = arith.constant 0 : index
    %c0_56 = arith.constant 0 : index
    %c0_57 = arith.constant 0 : index
    %153 = vector.load %arg10[%c0_55, %c0_56, %c0_57] : memref<2x64x32xbf16, #tpu.memory_space<vmem>>, vector<1x64x32xbf16>
    %154 = vector.shape_cast %153 : vector<1x64x32xbf16> to vector<64x32xbf16>
    %cst_58 = arith.constant dense<0.000000e+00> : vector<24x32xf32>
    %155 = tpu.matmul %152, %154, %cst_58 {dimension_numbers = #tpu.dot_dimension_numbers<[1], [0], [0], [1], [0, 0, 1, 1], [], []>} : vector<24x64xbf16>, vector<64x32xbf16>, vector<24x32xf32> -> vector<24x32xf32>
    %156 = vector.extract_strided_slice %31 {offsets = [3, 0], sizes = [1, 32], strides = [1, 1]} : vector<8x32xf32> to vector<1x32xf32>
    %157 = vector.broadcast %156 : vector<1x32xf32> to vector<24x32xf32>
    %158 = arith.addf %155, %157 : vector<24x32xf32>
    %159 = arith.addf %141, %158 : vector<24x32xf32>
    %160 = vector.extract_strided_slice %31 {offsets = [4, 0], sizes = [1, 32], strides = [1, 1]} : vector<8x32xf32> to vector<1x32xf32>
    %161 = vector.extract_strided_slice %31 {offsets = [5, 0], sizes = [1, 32], strides = [1, 1]} : vector<8x32xf32> to vector<1x32xf32>
    %cst_59 = arith.constant dense<0.000000e+00> : vector<24xf32>
    %162 = vector.multi_reduction <add>, %159, %cst_59 [1] : vector<24x32xf32> to vector<24xf32>
    %163 = vector.shape_cast %162 : vector<24xf32> to vector<24x1xf32>
    %cst_60 = arith.constant 3.200000e+01 : f32
    %164 = vector.broadcast %cst_60 : f32 to vector<24x1xf32>
    %165 = arith.divf %163, %164 : vector<24x1xf32>
    %166 = vector.broadcast %165 : vector<24x1xf32> to vector<24x32xf32>
    %167 = arith.subf %159, %166 : vector<24x32xf32>
    %168 = arith.mulf %167, %167 : vector<24x32xf32>
    %cst_61 = arith.constant dense<0.000000e+00> : vector<24xf32>
    %169 = vector.multi_reduction <add>, %168, %cst_61 [1] : vector<24x32xf32> to vector<24xf32>
    %170 = vector.shape_cast %169 : vector<24xf32> to vector<24x1xf32>
    %cst_62 = arith.constant 3.200000e+01 : f32
    %171 = vector.broadcast %cst_62 : f32 to vector<24x1xf32>
    %172 = arith.divf %170, %171 : vector<24x1xf32>
    %173 = vector.broadcast %165 : vector<24x1xf32> to vector<24x32xf32>
    %174 = arith.subf %159, %173 : vector<24x32xf32>
    %cst_63 = arith.constant 9.99999974E-6 : f32
    %175 = vector.broadcast %cst_63 : f32 to vector<24x1xf32>
    %176 = arith.addf %172, %175 : vector<24x1xf32>
    %177 = math.rsqrt %176 : vector<24x1xf32>
    %178 = vector.broadcast %177 : vector<24x1xf32> to vector<24x32xf32>
    %179 = arith.mulf %174, %178 : vector<24x32xf32>
    %180 = vector.broadcast %160 : vector<1x32xf32> to vector<24x32xf32>
    %181 = arith.mulf %179, %180 : vector<24x32xf32>
    %182 = vector.broadcast %161 : vector<1x32xf32> to vector<24x32xf32>
    %183 = arith.addf %181, %182 : vector<24x32xf32>
    %c1 = arith.constant 1 : index
    %c0_64 = arith.constant 0 : index
    %c0_65 = arith.constant 0 : index
    %184 = vector.load %arg11[%c1, %c0_64, %c0_65] : memref<2x8x32xf32, #tpu.memory_space<vmem>>, vector<1x8x32xf32>
    %185 = vector.shape_cast %184 : vector<1x8x32xf32> to vector<8x32xf32>
    %c1_66 = arith.constant 1 : index
    %c0_67 = arith.constant 0 : index
    %c0_68 = arith.constant 0 : index
    %186 = vector.load %arg6[%c1_66, %c0_67, %c0_68] : memref<2x1x96xf32, #tpu.memory_space<vmem>>, vector<1x1x96xf32>
    %187 = vector.shape_cast %186 : vector<1x1x96xf32> to vector<1x96xf32>
    %188 = arith.truncf %183 : vector<24x32xf32> to vector<24x32xbf16>
    %c1_69 = arith.constant 1 : index
    %c0_70 = arith.constant 0 : index
    %c0_71 = arith.constant 0 : index
    %189 = vector.load %arg5[%c1_69, %c0_70, %c0_71] : memref<2x32x96xbf16, #tpu.memory_space<vmem>>, vector<1x32x96xbf16>
    %190 = vector.shape_cast %189 : vector<1x32x96xbf16> to vector<32x96xbf16>
    %cst_72 = arith.constant dense<0.000000e+00> : vector<24x96xf32>
    %191 = tpu.matmul %188, %190, %cst_72 {dimension_numbers = #tpu.dot_dimension_numbers<[1], [0], [0], [1], [0, 0, 1, 1], [], []>} : vector<24x32xbf16>, vector<32x96xbf16>, vector<24x96xf32> -> vector<24x96xf32>
    %192 = vector.broadcast %187 : vector<1x96xf32> to vector<24x96xf32>
    %193 = arith.addf %191, %192 : vector<24x96xf32>
    %194 = arith.truncf %193 : vector<24x96xf32> to vector<24x96xbf16>
    %195 = vector.extract_strided_slice %194 {offsets = [0, 0], sizes = [24, 8], strides = [1, 1]} : vector<24x96xbf16> to vector<24x8xbf16>
    %196 = vector.extract_strided_slice %194 {offsets = [0, 32], sizes = [24, 8], strides = [1, 1]} : vector<24x96xbf16> to vector<24x8xbf16>
    %197 = vector.extract_strided_slice %194 {offsets = [0, 64], sizes = [24, 8], strides = [1, 1]} : vector<24x96xbf16> to vector<24x8xbf16>
    "tpu.trace_start"() <{level = 10 : i32, message = "qd,kd->qk"}> : () -> ()
    %cst_73 = arith.constant dense<0.000000e+00> : vector<24x24xf32>
    %198 = tpu.matmul %195, %196, %cst_73 {dimension_numbers = #tpu.dot_dimension_numbers<[1], [1], [0], [0], [0, 0, 1, 0], [], []>} : vector<24x8xbf16>, vector<24x8xbf16>, vector<24x24xf32> -> vector<24x24xf32>
    "tpu.trace_stop"() : () -> ()
    %199 = arith.addf %198, %29 : vector<24x24xf32>
    %cst_74 = arith.constant dense<0xFF800000> : vector<24xf32>
    %200 = vector.multi_reduction <maximumf>, %199, %cst_74 [1] : vector<24x24xf32> to vector<24xf32>
    %201 = vector.shape_cast %200 : vector<24xf32> to vector<24x1xf32>
    %202 = vector.broadcast %201 : vector<24x1xf32> to vector<24x24xf32>
    %203 = arith.subf %199, %202 : vector<24x24xf32>
    %204 = math.exp %203 : vector<24x24xf32>
    %cst_75 = arith.constant dense<0.000000e+00> : vector<24xf32>
    %205 = vector.multi_reduction <add>, %204, %cst_75 [1] : vector<24x24xf32> to vector<24xf32>
    %206 = vector.shape_cast %205 : vector<24xf32> to vector<24x1xf32>
    %207 = tpu.reciprocal %206 {approx = true} : vector<24x1xf32> -> vector<24x1xf32>
    %208 = vector.broadcast %207 : vector<24x1xf32> to vector<24x24xf32>
    %209 = arith.mulf %204, %208 : vector<24x24xf32>
    %210 = arith.truncf %209 : vector<24x24xf32> to vector<24x24xbf16>
    %cst_76 = arith.constant dense<0.000000e+00> : vector<24x8xf32>
    %211 = tpu.matmul %210, %197, %cst_76 {dimension_numbers = #tpu.dot_dimension_numbers<[1], [0], [0], [1], [0, 0, 1, 1], [], []>} : vector<24x24xbf16>, vector<24x8xbf16>, vector<24x8xf32> -> vector<24x8xf32>
    %212 = vector.extract_strided_slice %194 {offsets = [0, 8], sizes = [24, 8], strides = [1, 1]} : vector<24x96xbf16> to vector<24x8xbf16>
    %213 = vector.extract_strided_slice %194 {offsets = [0, 40], sizes = [24, 8], strides = [1, 1]} : vector<24x96xbf16> to vector<24x8xbf16>
    %214 = vector.extract_strided_slice %194 {offsets = [0, 72], sizes = [24, 8], strides = [1, 1]} : vector<24x96xbf16> to vector<24x8xbf16>
    "tpu.trace_start"() <{level = 10 : i32, message = "qd,kd->qk"}> : () -> ()
    %cst_77 = arith.constant dense<0.000000e+00> : vector<24x24xf32>
    %215 = tpu.matmul %212, %213, %cst_77 {dimension_numbers = #tpu.dot_dimension_numbers<[1], [1], [0], [0], [0, 0, 1, 0], [], []>} : vector<24x8xbf16>, vector<24x8xbf16>, vector<24x24xf32> -> vector<24x24xf32>
    "tpu.trace_stop"() : () -> ()
    %216 = arith.addf %215, %29 : vector<24x24xf32>
    %cst_78 = arith.constant dense<0xFF800000> : vector<24xf32>
    %217 = vector.multi_reduction <maximumf>, %216, %cst_78 [1] : vector<24x24xf32> to vector<24xf32>
    %218 = vector.shape_cast %217 : vector<24xf32> to vector<24x1xf32>
    %219 = vector.broadcast %218 : vector<24x1xf32> to vector<24x24xf32>
    %220 = arith.subf %216, %219 : vector<24x24xf32>
    %221 = math.exp %220 : vector<24x24xf32>
    %cst_79 = arith.constant dense<0.000000e+00> : vector<24xf32>
    %222 = vector.multi_reduction <add>, %221, %cst_79 [1] : vector<24x24xf32> to vector<24xf32>
    %223 = vector.shape_cast %222 : vector<24xf32> to vector<24x1xf32>
    %224 = tpu.reciprocal %223 {approx = true} : vector<24x1xf32> -> vector<24x1xf32>
    %225 = vector.broadcast %224 : vector<24x1xf32> to vector<24x24xf32>
    %226 = arith.mulf %221, %225 : vector<24x24xf32>
    %227 = arith.truncf %226 : vector<24x24xf32> to vector<24x24xbf16>
    %cst_80 = arith.constant dense<0.000000e+00> : vector<24x8xf32>
    %228 = tpu.matmul %227, %214, %cst_80 {dimension_numbers = #tpu.dot_dimension_numbers<[1], [0], [0], [1], [0, 0, 1, 1], [], []>} : vector<24x24xbf16>, vector<24x8xbf16>, vector<24x8xf32> -> vector<24x8xf32>
    %229 = vector.extract_strided_slice %194 {offsets = [0, 16], sizes = [24, 8], strides = [1, 1]} : vector<24x96xbf16> to vector<24x8xbf16>
    %230 = vector.extract_strided_slice %194 {offsets = [0, 48], sizes = [24, 8], strides = [1, 1]} : vector<24x96xbf16> to vector<24x8xbf16>
    %231 = vector.extract_strided_slice %194 {offsets = [0, 80], sizes = [24, 8], strides = [1, 1]} : vector<24x96xbf16> to vector<24x8xbf16>
    "tpu.trace_start"() <{level = 10 : i32, message = "qd,kd->qk"}> : () -> ()
    %cst_81 = arith.constant dense<0.000000e+00> : vector<24x24xf32>
    %232 = tpu.matmul %229, %230, %cst_81 {dimension_numbers = #tpu.dot_dimension_numbers<[1], [1], [0], [0], [0, 0, 1, 0], [], []>} : vector<24x8xbf16>, vector<24x8xbf16>, vector<24x24xf32> -> vector<24x24xf32>
    "tpu.trace_stop"() : () -> ()
    %233 = arith.addf %232, %29 : vector<24x24xf32>
    %cst_82 = arith.constant dense<0xFF800000> : vector<24xf32>
    %234 = vector.multi_reduction <maximumf>, %233, %cst_82 [1] : vector<24x24xf32> to vector<24xf32>
    %235 = vector.shape_cast %234 : vector<24xf32> to vector<24x1xf32>
    %236 = vector.broadcast %235 : vector<24x1xf32> to vector<24x24xf32>
    %237 = arith.subf %233, %236 : vector<24x24xf32>
    %238 = math.exp %237 : vector<24x24xf32>
    %cst_83 = arith.constant dense<0.000000e+00> : vector<24xf32>
    %239 = vector.multi_reduction <add>, %238, %cst_83 [1] : vector<24x24xf32> to vector<24xf32>
    %240 = vector.shape_cast %239 : vector<24xf32> to vector<24x1xf32>
    %241 = tpu.reciprocal %240 {approx = true} : vector<24x1xf32> -> vector<24x1xf32>
    %242 = vector.broadcast %241 : vector<24x1xf32> to vector<24x24xf32>
    %243 = arith.mulf %238, %242 : vector<24x24xf32>
    %244 = arith.truncf %243 : vector<24x24xf32> to vector<24x24xbf16>
    %cst_84 = arith.constant dense<0.000000e+00> : vector<24x8xf32>
    %245 = tpu.matmul %244, %231, %cst_84 {dimension_numbers = #tpu.dot_dimension_numbers<[1], [0], [0], [1], [0, 0, 1, 1], [], []>} : vector<24x24xbf16>, vector<24x8xbf16>, vector<24x8xf32> -> vector<24x8xf32>
    %246 = vector.extract_strided_slice %194 {offsets = [0, 24], sizes = [24, 8], strides = [1, 1]} : vector<24x96xbf16> to vector<24x8xbf16>
    %247 = vector.extract_strided_slice %194 {offsets = [0, 56], sizes = [24, 8], strides = [1, 1]} : vector<24x96xbf16> to vector<24x8xbf16>
    %248 = vector.extract_strided_slice %194 {offsets = [0, 88], sizes = [24, 8], strides = [1, 1]} : vector<24x96xbf16> to vector<24x8xbf16>
    "tpu.trace_start"() <{level = 10 : i32, message = "qd,kd->qk"}> : () -> ()
    %cst_85 = arith.constant dense<0.000000e+00> : vector<24x24xf32>
    %249 = tpu.matmul %246, %247, %cst_85 {dimension_numbers = #tpu.dot_dimension_numbers<[1], [1], [0], [0], [0, 0, 1, 0], [], []>} : vector<24x8xbf16>, vector<24x8xbf16>, vector<24x24xf32> -> vector<24x24xf32>
    "tpu.trace_stop"() : () -> ()
    %250 = arith.addf %249, %29 : vector<24x24xf32>
    %cst_86 = arith.constant dense<0xFF800000> : vector<24xf32>
    %251 = vector.multi_reduction <maximumf>, %250, %cst_86 [1] : vector<24x24xf32> to vector<24xf32>
    %252 = vector.shape_cast %251 : vector<24xf32> to vector<24x1xf32>
    %253 = vector.broadcast %252 : vector<24x1xf32> to vector<24x24xf32>
    %254 = arith.subf %250, %253 : vector<24x24xf32>
    %255 = math.exp %254 : vector<24x24xf32>
    %cst_87 = arith.constant dense<0.000000e+00> : vector<24xf32>
    %256 = vector.multi_reduction <add>, %255, %cst_87 [1] : vector<24x24xf32> to vector<24xf32>
    %257 = vector.shape_cast %256 : vector<24xf32> to vector<24x1xf32>
    %258 = tpu.reciprocal %257 {approx = true} : vector<24x1xf32> -> vector<24x1xf32>
    %259 = vector.broadcast %258 : vector<24x1xf32> to vector<24x24xf32>
    %260 = arith.mulf %255, %259 : vector<24x24xf32>
    %261 = arith.truncf %260 : vector<24x24xf32> to vector<24x24xbf16>
    %cst_88 = arith.constant dense<0.000000e+00> : vector<24x8xf32>
    %262 = tpu.matmul %261, %248, %cst_88 {dimension_numbers = #tpu.dot_dimension_numbers<[1], [0], [0], [1], [0, 0, 1, 1], [], []>} : vector<24x24xbf16>, vector<24x8xbf16>, vector<24x8xf32> -> vector<24x8xf32>
    %263 = tpu.concatenate %211, %228, %245, %262 in 1 : vector<24x8xf32>, vector<24x8xf32>, vector<24x8xf32>, vector<24x8xf32> -> vector<24x32xf32>
    %264 = arith.truncf %263 : vector<24x32xf32> to vector<24x32xbf16>
    %c1_89 = arith.constant 1 : index
    %c0_90 = arith.constant 0 : index
    %c0_91 = arith.constant 0 : index
    %265 = vector.load %arg7[%c1_89, %c0_90, %c0_91] : memref<2x32x32xbf16, #tpu.memory_space<vmem>>, vector<1x32x32xbf16>
    %266 = vector.shape_cast %265 : vector<1x32x32xbf16> to vector<32x32xbf16>
    %cst_92 = arith.constant dense<0.000000e+00> : vector<24x32xf32>
    %267 = tpu.matmul %264, %266, %cst_92 {dimension_numbers = #tpu.dot_dimension_numbers<[1], [0], [0], [1], [0, 0, 1, 1], [], []>} : vector<24x32xbf16>, vector<32x32xbf16>, vector<24x32xf32> -> vector<24x32xf32>
    %268 = vector.extract_strided_slice %185 {offsets = [0, 0], sizes = [1, 32], strides = [1, 1]} : vector<8x32xf32> to vector<1x32xf32>
    %269 = vector.broadcast %268 : vector<1x32xf32> to vector<24x32xf32>
    %270 = arith.addf %267, %269 : vector<24x32xf32>
    %271 = arith.addf %183, %270 : vector<24x32xf32>
    %272 = vector.extract_strided_slice %185 {offsets = [1, 0], sizes = [1, 32], strides = [1, 1]} : vector<8x32xf32> to vector<1x32xf32>
    %273 = vector.extract_strided_slice %185 {offsets = [2, 0], sizes = [1, 32], strides = [1, 1]} : vector<8x32xf32> to vector<1x32xf32>
    %cst_93 = arith.constant dense<0.000000e+00> : vector<24xf32>
    %274 = vector.multi_reduction <add>, %271, %cst_93 [1] : vector<24x32xf32> to vector<24xf32>
    %275 = vector.shape_cast %274 : vector<24xf32> to vector<24x1xf32>
    %cst_94 = arith.constant 3.200000e+01 : f32
    %276 = vector.broadcast %cst_94 : f32 to vector<24x1xf32>
    %277 = arith.divf %275, %276 : vector<24x1xf32>
    %278 = vector.broadcast %277 : vector<24x1xf32> to vector<24x32xf32>
    %279 = arith.subf %271, %278 : vector<24x32xf32>
    %280 = arith.mulf %279, %279 : vector<24x32xf32>
    %cst_95 = arith.constant dense<0.000000e+00> : vector<24xf32>
    %281 = vector.multi_reduction <add>, %280, %cst_95 [1] : vector<24x32xf32> to vector<24xf32>
    %282 = vector.shape_cast %281 : vector<24xf32> to vector<24x1xf32>
    %cst_96 = arith.constant 3.200000e+01 : f32
    %283 = vector.broadcast %cst_96 : f32 to vector<24x1xf32>
    %284 = arith.divf %282, %283 : vector<24x1xf32>
    %285 = vector.broadcast %277 : vector<24x1xf32> to vector<24x32xf32>
    %286 = arith.subf %271, %285 : vector<24x32xf32>
    %cst_97 = arith.constant 9.99999974E-6 : f32
    %287 = vector.broadcast %cst_97 : f32 to vector<24x1xf32>
    %288 = arith.addf %284, %287 : vector<24x1xf32>
    %289 = math.rsqrt %288 : vector<24x1xf32>
    %290 = vector.broadcast %289 : vector<24x1xf32> to vector<24x32xf32>
    %291 = arith.mulf %286, %290 : vector<24x32xf32>
    %292 = vector.broadcast %272 : vector<1x32xf32> to vector<24x32xf32>
    %293 = arith.mulf %291, %292 : vector<24x32xf32>
    %294 = vector.broadcast %273 : vector<1x32xf32> to vector<24x32xf32>
    %295 = arith.addf %293, %294 : vector<24x32xf32>
    %296 = arith.truncf %295 : vector<24x32xf32> to vector<24x32xbf16>
    %c1_98 = arith.constant 1 : index
    %c0_99 = arith.constant 0 : index
    %c0_100 = arith.constant 0 : index
    %297 = vector.load %arg8[%c1_98, %c0_99, %c0_100] : memref<2x32x64xbf16, #tpu.memory_space<vmem>>, vector<1x32x64xbf16>
    %298 = vector.shape_cast %297 : vector<1x32x64xbf16> to vector<32x64xbf16>
    %cst_101 = arith.constant dense<0.000000e+00> : vector<24x64xf32>
    %299 = tpu.matmul %296, %298, %cst_101 {dimension_numbers = #tpu.dot_dimension_numbers<[1], [0], [0], [1], [0, 0, 1, 1], [], []>} : vector<24x32xbf16>, vector<32x64xbf16>, vector<24x64xf32> -> vector<24x64xf32>
    %c1_102 = arith.constant 1 : index
    %c0_103 = arith.constant 0 : index
    %c0_104 = arith.constant 0 : index
    %300 = vector.load %arg9[%c1_102, %c0_103, %c0_104] : memref<2x1x64xf32, #tpu.memory_space<vmem>>, vector<1x1x64xf32>
    %301 = vector.shape_cast %300 : vector<1x1x64xf32> to vector<1x64xf32>
    %302 = vector.broadcast %301 : vector<1x64xf32> to vector<24x64xf32>
    %303 = arith.addf %299, %302 : vector<24x64xf32>
    %cst_105 = arith.constant 0.000000e+00 : f32
    %304 = vector.broadcast %cst_105 : f32 to vector<24x64xf32>
    %305 = arith.maximumf %303, %304 : vector<24x64xf32>
    %306 = arith.truncf %305 : vector<24x64xf32> to vector<24x64xbf16>
    %c1_106 = arith.constant 1 : index
    %c0_107 = arith.constant 0 : index
    %c0_108 = arith.constant 0 : index
    %307 = vector.load %arg10[%c1_106, %c0_107, %c0_108] : memref<2x64x32xbf16, #tpu.memory_space<vmem>>, vector<1x64x32xbf16>
    %308 = vector.shape_cast %307 : vector<1x64x32xbf16> to vector<64x32xbf16>
    %cst_109 = arith.constant dense<0.000000e+00> : vector<24x32xf32>
    %309 = tpu.matmul %306, %308, %cst_109 {dimension_numbers = #tpu.dot_dimension_numbers<[1], [0], [0], [1], [0, 0, 1, 1], [], []>} : vector<24x64xbf16>, vector<64x32xbf16>, vector<24x32xf32> -> vector<24x32xf32>
    %310 = vector.extract_strided_slice %185 {offsets = [3, 0], sizes = [1, 32], strides = [1, 1]} : vector<8x32xf32> to vector<1x32xf32>
    %311 = vector.broadcast %310 : vector<1x32xf32> to vector<24x32xf32>
    %312 = arith.addf %309, %311 : vector<24x32xf32>
    %313 = arith.addf %295, %312 : vector<24x32xf32>
    %314 = vector.extract_strided_slice %185 {offsets = [4, 0], sizes = [1, 32], strides = [1, 1]} : vector<8x32xf32> to vector<1x32xf32>
    %315 = vector.extract_strided_slice %185 {offsets = [5, 0], sizes = [1, 32], strides = [1, 1]} : vector<8x32xf32> to vector<1x32xf32>
    %cst_110 = arith.constant dense<0.000000e+00> : vector<24xf32>
    %316 = vector.multi_reduction <add>, %313, %cst_110 [1] : vector<24x32xf32> to vector<24xf32>
    %317 = vector.shape_cast %316 : vector<24xf32> to vector<24x1xf32>
    %cst_111 = arith.constant 3.200000e+01 : f32
    %318 = vector.broadcast %cst_111 : f32 to vector<24x1xf32>
    %319 = arith.divf %317, %318 : vector<24x1xf32>
    %320 = vector.broadcast %319 : vector<24x1xf32> to vector<24x32xf32>
    %321 = arith.subf %313, %320 : vector<24x32xf32>
    %322 = arith.mulf %321, %321 : vector<24x32xf32>
    %cst_112 = arith.constant dense<0.000000e+00> : vector<24xf32>
    %323 = vector.multi_reduction <add>, %322, %cst_112 [1] : vector<24x32xf32> to vector<24xf32>
    %324 = vector.shape_cast %323 : vector<24xf32> to vector<24x1xf32>
    %cst_113 = arith.constant 3.200000e+01 : f32
    %325 = vector.broadcast %cst_113 : f32 to vector<24x1xf32>
    %326 = arith.divf %324, %325 : vector<24x1xf32>
    %327 = vector.broadcast %319 : vector<24x1xf32> to vector<24x32xf32>
    %328 = arith.subf %313, %327 : vector<24x32xf32>
    %cst_114 = arith.constant 9.99999974E-6 : f32
    %329 = vector.broadcast %cst_114 : f32 to vector<24x1xf32>
    %330 = arith.addf %326, %329 : vector<24x1xf32>
    %331 = math.rsqrt %330 : vector<24x1xf32>
    %332 = vector.broadcast %331 : vector<24x1xf32> to vector<24x32xf32>
    %333 = arith.mulf %328, %332 : vector<24x32xf32>
    %334 = vector.broadcast %314 : vector<1x32xf32> to vector<24x32xf32>
    %335 = arith.mulf %333, %334 : vector<24x32xf32>
    %336 = vector.broadcast %315 : vector<1x32xf32> to vector<24x32xf32>
    %337 = arith.addf %335, %336 : vector<24x32xf32>
    %338 = vector.extract_strided_slice %337 {offsets = [0, 0], sizes = [8, 32], strides = [1, 1]} : vector<24x32xf32> to vector<8x32xf32>
    %c0_115 = arith.constant 0 : index
    %c0_116 = arith.constant 0 : index
    %c0_117 = arith.constant 0 : index
    %339 = vector.load %arg12[%c0_115, %c0_116, %c0_117] : memref<1x8x32xf32, #tpu.memory_space<vmem>>, vector<1x8x32xf32>
    %340 = vector.shape_cast %339 : vector<1x8x32xf32> to vector<8x32xf32>
    %341 = vector.shape_cast %338 : vector<8x32xf32> to vector<1x8x32xf32>
    tpu.vector_store %arg12[%c0_115, %c0_116, %c0_117], %341 {strides = array<i32>} : memref<1x8x32xf32, #tpu.memory_space<vmem>>, vector<1x8x32xf32>,
    return
  }
  func.func @transform_0(%arg0: i32) -> (i32, i32, i32) {
    %c0_i32 = arith.constant 0 : i32
    %c0_i32_0 = arith.constant 0 : i32
    %c0_i32_1 = arith.constant 0 : i32
    return %arg0, %c0_i32, %c0_i32_0 : i32, i32, i32
  }
  func.func @transform_1(%arg0: i32) -> (i32, i32) {
    %c0_i32 = arith.constant 0 : i32
    %c0_i32_0 = arith.constant 0 : i32
    %c0_i32_1 = arith.constant 0 : i32
    return %c0_i32, %c0_i32_0 : i32, i32
  }
  func.func @transform_2(%arg0: i32) -> (i32, i32) {
    %c0_i32 = arith.constant 0 : i32
    %c0_i32_0 = arith.constant 0 : i32
    %c0_i32_1 = arith.constant 0 : i32
    return %c0_i32, %c0_i32_0 : i32, i32
  }
  func.func @transform_3(%arg0: i32) -> (i32, i32) {
    %c0_i32 = arith.constant 0 : i32
    %c0_i32_0 = arith.constant 0 : i32
    %c0_i32_1 = arith.constant 0 : i32
    return %c0_i32, %c0_i32_0 : i32, i32
  }
  func.func @transform_4(%arg0: i32) -> (i32, i32, i32) {
    %c0_i32 = arith.constant 0 : i32
    %c0_i32_0 = arith.constant 0 : i32
    %c0_i32_1 = arith.constant 0 : i32
    %c0_i32_2 = arith.constant 0 : i32
    return %c0_i32, %c0_i32_0, %c0_i32_1 : i32, i32, i32
  }
  func.func @transform_5(%arg0: i32) -> (i32, i32, i32) {
    %c0_i32 = arith.constant 0 : i32
    %c0_i32_0 = arith.constant 0 : i32
    %c0_i32_1 = arith.constant 0 : i32
    %c0_i32_2 = arith.constant 0 : i32
    return %c0_i32, %c0_i32_0, %c0_i32_1 : i32, i32, i32
  }
  func.func @transform_6(%arg0: i32) -> (i32, i32, i32) {
    %c0_i32 = arith.constant 0 : i32
    %c0_i32_0 = arith.constant 0 : i32
    %c0_i32_1 = arith.constant 0 : i32
    %c0_i32_2 = arith.constant 0 : i32
    return %c0_i32, %c0_i32_0, %c0_i32_1 : i32, i32, i32
  }
  func.func @transform_7(%arg0: i32) -> (i32, i32, i32) {
    %c0_i32 = arith.constant 0 : i32
    %c0_i32_0 = arith.constant 0 : i32
    %c0_i32_1 = arith.constant 0 : i32
    %c0_i32_2 = arith.constant 0 : i32
    return %c0_i32, %c0_i32_0, %c0_i32_1 : i32, i32, i32
  }
  func.func @transform_8(%arg0: i32) -> (i32, i32, i32) {
    %c0_i32 = arith.constant 0 : i32
    %c0_i32_0 = arith.constant 0 : i32
    %c0_i32_1 = arith.constant 0 : i32
    %c0_i32_2 = arith.constant 0 : i32
    return %c0_i32, %c0_i32_0, %c0_i32_1 : i32, i32, i32
  }
  func.func @transform_9(%arg0: i32) -> (i32, i32, i32) {
    %c0_i32 = arith.constant 0 : i32
    %c0_i32_0 = arith.constant 0 : i32
    %c0_i32_1 = arith.constant 0 : i32
    %c0_i32_2 = arith.constant 0 : i32
    return %c0_i32, %c0_i32_0, %c0_i32_1 : i32, i32, i32
  }
  func.func @transform_10(%arg0: i32) -> (i32, i32, i32) {
    %c0_i32 = arith.constant 0 : i32
    %c0_i32_0 = arith.constant 0 : i32
    %c0_i32_1 = arith.constant 0 : i32
    %c0_i32_2 = arith.constant 0 : i32
    return %c0_i32, %c0_i32_0, %c0_i32_1 : i32, i32, i32
  }
  func.func @transform_11(%arg0: i32) -> (i32, i32, i32) {
    %c0_i32 = arith.constant 0 : i32
    %c0_i32_0 = arith.constant 0 : i32
    %c0_i32_1 = arith.constant 0 : i32
    return %arg0, %c0_i32, %c0_i32_0 : i32, i32, i32
  }
}

</mosaic_0001>

<bundles_post_ra>
// kernel: encoder_vl_forward_pallas.1
= control target key start
LH: loop header
LB: loop body
LE: loop exit
PB: predicated region body
PF: predicated region fallthrough
CT: control target
= control target key end

     0   :  { %s4245_s0 = inlined_call_operand.vmem [shape: f32[2,24,32], index: 0, kind: input, shape index: {}]   ;;  %s4246_s1 = inlined_call_operand.vmem [shape: f32[24,32], index: 1, kind: input, shape index: {}]   ;;  %s4247_s2 = inlined_call_operand.vmem [shape: f32[24,24], index: 2, kind: input, shape index: {}]   ;;  %s4248_s3 = inlined_call_operand.vmem [shape: f32[2,32], index: 3, kind: input, shape index: {}]   ;;  %s4249_s4 = inlined_call_operand.vmem [shape: bf16[2,32,96], index: 4, kind: input, shape index: {}]   ;;  %s4250_s5 = inlined_call_operand.vmem [shape: f32[2,1,96], index: 5, kind: input, shape index: {}]   ;;  %s4251_s6 = inlined_call_operand.vmem [shape: bf16[2,32,32], index: 6, kind: input, shape index: {}]   ;;  %s4252_s7 = inlined_call_operand.vmem [shape: bf16[2,32,64], index: 7, kind: input, shape index: {}]   ;;  %s4253_s8 = inlined_call_operand.vmem [shape: f32[2,1,64], index: 8, kind: input, shape index: {}]   ;;  %s4254_s9 = inlined_call_operand.vmem [shape: bf16[2,64,32], index: 9, kind: input, shape index: {}]   ;;  %s4255_s10 = inlined_call_operand.vmem [shape: f32[2,8,32], index: 10, kind: input, shape index: {}]   ;;  %s4256_s11 = inlined_call_operand.hbm [shape: f32[2,8,32], index: 11, kind: output, shape index: {}]  }
   0x1   :  { %4279 = sst [smem:[#allocation6_spill]] %s4245_s0 }
   0x2   :  { %16 = vsyncpa [#allocation3], 0 }
   0x3   :  { %18 = vsyncpa [#allocation3 + $0x1], 0  ;;  %s3595_s17 = smov 0   ;;  %s3597_s18 = smov 0  }
   0x4   :  { %s3599_s19 = smov 0   ;;  %s3601_s20 = smov 0  }
   0x5 LB: > { %s3616_s21 = sadd.s32 4294967295, %s3518_s20   ;;  %s2800_s22 = sadd.s32 4294967294, %s3518_s20   ;;  %s3518_s20 = sphi %s3601_s20, %s4299_s20   ;;  %s3514_s19 = sphi %s3599_s19, %s4298_s19   ;;  %s3510_s18 = sphi %s3597_s18, %s4297_s18   ;;  %s3506_s17 = sphi %s3595_s17, %s4296_s17  }
   0x6   : > { %s3620_s23 = sadd.s32 1, %s3518_s20   ;;  %s267_s24 = sadd.s32 1, %s3514_s19 }
   0x7   : > { %s264_s25 = ssub.s32 %s3518_s20, %s3620_s23  ;;  %p277_p0 = scmp.ne.s32.totalorder %s3514_s19, %s3510_s18 }
   0x8   : > { %p265_p1 = scmp.eq.s32.totalorder %s264_s25, 0  ;;  %p278_p2 = scmp.eq.s32.totalorder %s3616_s21, 1 }
   0x9   : > { %p283_p3 = scmp.ne.s32.totalorder %s3510_s18, %s3506_s17  ;;  %p284_p4 = scmp.eq.s32.totalorder %s2800_s22, 1 }
   0xa   : > { %s3631_s26 = scalar_select %p265_p1, %s3514_s19, %s267_s24  }
   0xb   : > { %p3633_p5 = por %p278_p2, %p277_p0  ;;  %p3637_p6 = por %p284_p4, %p283_p3 }
   0xc   : > { %4280 = sst [smem:[#allocation5_spill]] %s3631_s26  ;;  %p2803_p7 = scmp.ge.s32.totalorder %s3518_s20, 1 }
   0xd   : > { %p340_p8 = scmp.lt.s32.totalorder %s3518_s20, 3 }
   0xf   : > { %p341_p9 = pnand %p2803_p7, %p340_p8 }
  0x10   : > { %p380_p10 = scmp.lt.s32.totalorder (!%p341_p9), %s3616_s21, 1  ;;  %s4283_s0 = sld [smem:[#allocation6_spill]] (!%p341_p9) }
  0x11   : > { %344 = sbr.rel (%p341_p9) target bundleno = 8363 (0x20ab), region = 64  ;;  %s3520_s22 = smov (!%p341_p9), 96  }
  0x12   : > { %s3521_s13 = smov (!%p341_p9), 64   ;;  %s3522_s14 = smov (!%p341_p9), 120  }
  0x13   : > { %s4275_s16 = smov (!%p341_p9), 56   ;;  %s4273_s24 = smov (!%p341_p9), 80  }
  0x14   : > { %s4269_s25 = smov (!%p341_p9), 112   ;;  %s4257_s30 = smov (!%p341_p9), 104  }
  0x15   : > { %s4265_s12 = smov (!%p341_p9), 40  }
  0x16   : > { %s381_s29 = scalar_select %p380_p10, %s3616_s21, 1  ;;  %v390_v0 = vld [vmem:[%s4246_s1] sm:$0xff]  ;;  %v392_v1 = vld [vmem:[%s4246_s1 + $0x10] sm:$0xff]  ;;  %v391_v2 = vld [vmem:[%s4246_s1 + $0x8] sm:$0xff]  ;;  %vm396_vm0 = vcmask 261120   ;;  %v437_v38 = vlaneseq  ;;  %vm542_vm1 = vcmask 64512  }
  0x17   : > { %v3313_v27 = vld [vmem:[%s4249_s4 + $0x8] sm:$0xff]   ;;  %v3314_v28 = vld [vmem:[%s4249_s4] sm:$0xff]   ;;  %vm603_vm2 = vcmask 195584   ;;  %vm650_vm3 = vcmask 1043456   ;;  %vm1236_vm4 = vcmask 130048   ;;  %vm1495_vm5 = vcmask 523264  }
  0x18   : > { %s3229_s15 = smul.u32 24, %s381_s29  ;;  %3005 = vmatprep.subr.bf16.mxu1 %v3313_v27  ;;  %v3669_v39 = vshrl.u32 %v437_v38, 7  ;;  %v386_v41 = vld [vmem:[%s4248_s3] sm:$0x3]  ;;  %s4259_s29 = smov 72  }
  0x19   : > { %3006 = vmatpush3.bf16.msra.mxu1 %v3313_v27  ;;  %v2806_v59 = vld [vmem:[%s4250_s5] ss:$0 sm:$0xff] }
  0x1a   : > { %s384_s26 = scalar_lea.vmem %s4283_s0, %s3229_s15  ;;  %3007 = vmatprep.subr.bf16.mxu1 %v3314_v28  ;;  %v3672_v40 = vsub.s32 0, %v3669_v39  ;;  %v3679_v45 = vsub.s32 1, %v3669_v39  ;;  %s4277_s15 = smov 88  }
  0x1b   : > { %v387_v3 = vld [vmem:[%s384_s26] sm:$0xff]  ;;  %v389_v4 = vld [vmem:[%s384_s26 + $0x10] sm:$0xff]  ;;  %v388_v5 = vld [vmem:[%s384_s26 + $0x8] sm:$0xff]  ;;  %s4267_s26 = smov 48  }
  0x1c   : > { %v393_v6 = vadd.f32 %v390_v0, %v387_v3  ;;  %v395_v7 = vadd.f32 %v392_v1, %v389_v4  ;;  %v394_v8 = vadd.f32 %v391_v2, %v388_v5  ;;  %v440_v44 = vrot.slane %v386_v41, %v3672_v40 }
  0x1d   : > { %3008 = vmatpush3.bf16.msra.mxu1 %v3314_v28  ;;  %v447_v51 = vrot.slane %v386_v41, %v3679_v45 }
  0x1e   : > { %v397_v9 = vsel %vm396_vm0, %v393_v6, 0.0  ;;  %v403_v10 = vsel %vm396_vm0, %v395_v7, 0.0  ;;  %v400_v11 = vsel %vm396_vm0, %v394_v8, 0.0 }
  0x1f   : > { %398 = vadd.xlane.f32.xlu0 %v397_v9  ;;  %404 = vadd.xlane.f32.xlu1 %v403_v10  ;;  %v3716_v10 = vld [vmem:[%s4247_s2] sm:$0xff] }
  0x23   : > { %401 = vadd.xlane.f32.xlu0 %v400_v11 }
  0xa8   : > { %v399_v12 = vpop.xlane.xlu0 %398  ;;  %v405_v13 = vpop.xlane.xlu1 %404 }
  0xa9   : > { %v407_v14 = vmul.f32 0.03125, %v399_v12  ;;  %v409_v15 = vmul.f32 0.03125, %v405_v13 }
  0xab   : > { %v410_v16 = vsub.f32 %v393_v6, %v407_v14  ;;  %v412_v17 = vsub.f32 %v395_v7, %v409_v15  ;;  %v3722_v14 = vld [vmem:[%s4247_s2 + $0x8] sm:$0xff] }
  0xac   : > { %v402_v18 = vpop.xlane.xlu0 %401 }
  0xad   : > { %v408_v19 = vmul.f32 0.03125, %v402_v18  ;;  %v413_v20 = vmul.f32 %v410_v16, %v410_v16  ;;  %v415_v21 = vmul.f32 %v412_v17, %v412_v17 }
  0xaf   : > { %v411_v22 = vsub.f32 %v394_v8, %v408_v19  ;;  %v416_v23 = vsel %vm396_vm0, %v413_v20, 0.0  ;;  %v422_v24 = vsel %vm396_vm0, %v415_v21, 0.0 }
  0xb0   : > { %417 = vadd.xlane.f32.xlu1 %v416_v23 }
  0xb1   : > { %v414_v25 = vmul.f32 %v411_v22, %v411_v22 }
  0xb3   : > { %v419_v26 = vsel %vm396_vm0, %v414_v25, 0.0 }
  0xb4   : > { %423 = vadd.xlane.f32.xlu1 %v422_v24  ;;  %420 = vadd.xlane.f32.xlu0 %v419_v26 }
 0x139   : > { %v418_v29 = vpop.xlane.xlu1 %417 }
 0x13a   : > { %v425_v30 = vmul.f32 0.03125, %v418_v29 }
 0x13c   : > { %v428_v31 = vadd.f32 1e-05, %v425_v30 }
 0x13d   : > { %v424_v32 = vpop.xlane.xlu1 %423  ;;  %v421_v33 = vpop.xlane.xlu0 %420 }
 0x13e   : > { %3333 = vrsqrt.f32 %v428_v31  ;;  %v427_v34 = vmul.f32 0.03125, %v424_v32  ;;  %v426_v35 = vmul.f32 0.03125, %v421_v33 }
 0x140   : > { %v430_v36 = vadd.f32 1e-05, %v427_v34  ;;  %v429_v37 = vadd.f32 1e-05, %v426_v35 }
 0x142   : > { %3335 = vrsqrt.f32 %v430_v36 }
 0x143   : > { %3337 = vrsqrt.f32 %v429_v37 }
 0x14b   : > { %v3334_v42 = vpop.eup %3333 }
 0x14c   : > { %v434_v43 = vmul.f32 %v3334_v42, %v410_v16  ;;  %v3728_v16 = vld [vmem:[%s4247_s2 + $0x10] sm:$0xff] }
 0x14e   : > { %v441_v50 = vmul.f32 %v440_v44, %v434_v43 }
 0x14f   : > { %v3336_v46 = vpop.eup %3335 }
 0x150   : > { %v3338_v47 = vpop.eup %3337  ;;  %v436_v48 = vmul.f32 %v3336_v46, %v412_v17  ;;  %v3684_v55 = vadd.f32 %v447_v51, %v441_v50 }
 0x151   : > { %v435_v49 = vmul.f32 %v3338_v47, %v411_v22 }
 0x152   : > { %v443_v52 = vmul.f32 %v440_v44, %v436_v48 }
 0x153   : > { %v442_v53 = vmul.f32 %v440_v44, %v435_v49 }
 0x154   : > { %v3682_v54 = vadd.f32 %v447_v51, %v443_v52 }
 0x155   : > { %v3686_v56 = vadd.f32 %v447_v51, %v442_v53 }
 0x156   : > { %v457_v57 = vpack.c.bf16 %v3682_v54, %v3682_v54 }
 0x157   : > { %v456_v58 = vpack.c.bf16 %v3686_v56, %v3684_v55 }
 0x159   : > { %3009 = vmatprep.mubr.msk.bf16.mxu1 %vm396_vm0, %v456_v58 }
 0x15a   : > { %3010 = vmatmul.mubr.msk.bf16.vlgmr.msra.gmra.mxu1 %vm396_vm0, %v457_v57 }
 0x21a   : > { %v3011_v60 = vpop.f32.mrf.mxu1 }
 0x21b   : > { %v529_v61 = vadd.f32 %v3011_v60, %v2806_v59 }
 0x21c   : > { %v520_v62 = vpop.f32.mrf.mxu1 }
 0x21d   : > { %v3697_v63 = vpack.c.bf16 %v529_v61, %v529_v61  ;;  %v521_v2 = vadd.f32 %v2806_v59, %v520_v62 }
 0x21e   : > { %v3012_v0 = vpop.f32.mrf.mxu1 }
 0x21f   : > { %540 = vrot.lane.b32.xlu0 %v3697_v63, %s3520_s22 }
 0x220   : > { %v523_v1 = vpop.f32.mrf.mxu1 }
 0x221   : > { %v524_v3 = vadd.f32 %v2806_v59, %v523_v1 }
 0x223   : > { %v3701_v4 = vpack.c.bf16 %v524_v3, %v521_v2 }
 0x225   : > { %538 = vrot.lane.b32.xlu1 %v3701_v4, %s3520_s22  ;;  %3017 = vmatprep.mubr.msk.bf16.mxu1 %vm542_vm1, %v3701_v4 }
 0x291   : > { %v541_v5 = vpop.permute.xlu0 %540 }
 0x292   : > { %3205 = vmatprep.subr.msk.bf16.mxu1 %vm542_vm1, %v541_v5  ;;  %v553_v6 = vsel %vm542_vm1, %v541_v5, 0 }
 0x293   : > { %3014 = vmatpush3.bf16.xpose.msra.mxu1 %v553_v6 }
 0x297   : > { %v539_v7 = vpop.permute.xlu1 %538 }
 0x298   : > { %3206 = vmatprep.subr.msk.bf16.mxu1 %vm542_vm1, %v539_v7  ;;  %v550_v8 = vsel %vm542_vm1, %v539_v7, 0 }
 0x29b   : > { %3016 = vmatpush3.bf16.xpose.msra.mxu1 %v550_v8 }
 0x2a2   : > { %3018 = vmatmul.mubr.msk.bf16.vlgmr.msra.gmra.mxu1 %vm542_vm1, %v3697_v63 }
 0x362   : > { %v3019_v9 = vpop.f32.mrf.mxu1 }
 0x363   : > { %v598_v19 = vadd.f32 %v3019_v9, %v3728_v16 }
 0x364   : > { %v589_v11 = vpop.f32.mrf.mxu1 }
 0x365   : > { %v590_v12 = vadd.f32 %v589_v11, %v3716_v10  ;;  %v610_v21 = vsel %vm603_vm2, %v598_v19, -inf }
 0x366   : > { %v3020_v13 = vpop.f32.mrf.mxu1 }
 0x367   : > { %v604_v15 = vsel %vm603_vm2, %v590_v12, -inf }
 0x368   : > { %v592_v17 = vpop.f32.mrf.mxu1  ;;  %605 = vmax.xlane.f32.xlu1 %v604_v15 }
 0x369   : > { %v593_v18 = vadd.f32 %v592_v17, %v3722_v14 }
 0x36b   : > { %v607_v20 = vsel %vm603_vm2, %v593_v18, -inf }
 0x36c   : > { %608 = vmax.xlane.f32.xlu0 %v607_v20 }
 0x370   : > { %611 = vmax.xlane.f32.xlu0 %v610_v21 }
 0x3f1   : > { %v606_v22 = vpop.xlane.xlu1 %605 }
 0x3f2   : > { %v613_v25 = vsub.f32 %v590_v12, %v606_v22 }
 0x3f4   : > { %v616_v29 = vmul.f32 1.442695, %v613_v25 }
 0x3f5   : > { %v609_v23 = vpop.xlane.xlu0 %608 }
 0x3f6   : > { %v614_v24 = vsub.f32 %v593_v18, %v609_v23 }
 0x3f8   : > { %v618_v26 = vmul.f32 1.442695, %v614_v24 }
 0x3f9   : > { %v612_v27 = vpop.xlane.xlu0 %611 }
 0x3fa   : > { %3339 = vpow2.f32 %v618_v26  ;;  %v615_v28 = vsub.f32 %v598_v19, %v612_v27 }
 0x3fc   : > { %v620_v30 = vmul.f32 1.442695, %v615_v28 }
 0x3fe   : > { %3341 = vpow2.f32 %v620_v30 }
 0x3ff   : > { %3343 = vpow2.f32 %v616_v29 }
 0x407   : > { %v3340_v31 = vpop.eup %3339 }
 0x408   : > { %v625_v32 = vsel %vm603_vm2, %v3340_v31, 0.0 }
 0x409   : > { %626 = vadd.xlane.f32.xlu0 %v625_v32 }
 0x40b   : > { %v3342_v33 = vpop.eup %3341 }
 0x40c   : > { %v628_v34 = vsel %vm603_vm2, %v3342_v33, 0.0  ;;  %v3344_v35 = vpop.eup %3343 }
 0x40d   : > { %629 = vadd.xlane.f32.xlu1 %v628_v34  ;;  %v622_v36 = vsel %vm603_vm2, %v3344_v35, 0.0 }
 0x411   : > { %623 = vadd.xlane.f32.xlu1 %v622_v36 }
 0x41f   : > { %641 = vrot.lane.b32.xlu0 %v3697_v63, %s3521_s13 }
 0x422   : > { %639 = vrot.lane.b32.xlu1 %v3701_v4, %s3521_s13 }
 0x423   : > { %702 = vrot.lane.b32.xlu0 %v3701_v4, %s3522_s14 }
 0x426   : > { %708 = vrot.lane.b32.xlu1 %v3697_v63, %s4277_s15 }
 0x42a   : > { %706 = vrot.lane.b32.xlu1 %v3701_v4, %s4277_s15  ;;  %s4292_s15 = smov 8  }
 0x42e   : > { %704 = vrot.lane.b32.xlu1 %v3697_v63, %s3522_s14 }
 0x492   : > { %v627_v37 = vpop.xlane.xlu0 %626 }
 0x496   : > { %v642_v38 = vpop.permute.xlu0 %641  ;;  %v630_v41 = vpop.xlane.xlu1 %629 }
 0x497   : > { %3207 = vmatprep.subr.msk.bf16.mxu0 %vm650_vm3, %v642_v38  ;;  %v652_v42 = vsel %vm650_vm3, %v642_v38, 0  ;;  %3345 = vrcp.f32 %v630_v41 }
 0x498   : > { %3022 = vmatpush3.bf16.msra.mxu0 %v652_v42  ;;  %3347 = vrcp.f32 %v627_v37 }
 0x49a   : > { %v624_v43 = vpop.xlane.xlu1 %623  ;;  %v703_v58 = vpop.permute.xlu0 %702 }
 0x49b   : > { %3349 = vrcp.f32 %v624_v43 }
 0x49e   : > { %v640_v44 = vpop.permute.xlu1 %639 }
 0x49f   : > { %3023 = vmatprep.subr.bf16.mxu0 %v640_v44 }
 0x4a0   : > { %3024 = vmatpush3.bf16.msra.mxu0 %v640_v44 }
 0x4a2   : > { %v709_v46 = vpop.permute.xlu1 %708 }
 0x4a3   : > { %3208 = vmatprep.subr.msk.bf16.mxu0 %vm542_vm1, %v709_v46  ;;  %v720_v59 = vsel %vm542_vm1, %v709_v46, 0 }
 0x4a4   : > { %v3346_v47 = vpop.eup %3345 }
 0x4a5   : > { %v3348_v48 = vpop.eup %3347  ;;  %v636_v50 = vmul.f32 %v3346_v47, %v3342_v33 }
 0x4a6   : > { %v635_v52 = vmul.f32 %v3348_v48, %v3340_v31  ;;  %v707_v60 = vpop.permute.xlu1 %706 }
 0x4a7   : > { %v638_v57 = vpack.c.bf16 %v636_v50, %v636_v50  ;;  %v717_v61 = vsel %vm542_vm1, %v707_v60, 0 }
 0x4a8   : > { %v3350_v49 = vpop.eup %3349 }
 0x4a9   : > { %v634_v51 = vmul.f32 %v3350_v49, %v3344_v35 }
 0x4aa   : > { %v705_v62 = vpop.permute.xlu1 %704 }
 0x4ab   : > { %v637_v53 = vpack.c.bf16 %v635_v52, %v634_v51 }
 0x4ad   : > { %3025 = vmatprep.mubr.msk.bf16.mxu0 %vm603_vm2, %v637_v53 }
 0x4ae   : > { %3026 = vmatmul.mubr.msk.bf16.vlgmr.msra.gmra.mxu0 %vm603_vm2, %v638_v57 }
 0x4af   : > { %3030 = vmatpush3.bf16.xpose.msra.mxu0 %v720_v59  ;;  %3033 = vmatprep.mubr.msk.bf16.mxu0 %vm542_vm1, %v703_v58 }
 0x4b0   : > { %3209 = vmatprep.subr.msk.bf16.mxu0 %vm542_vm1, %v707_v60 }
 0x4b7   : > { %3032 = vmatpush3.bf16.xpose.msra.mxu0 %v717_v61 }
 0x4be   : > { %3034 = vmatmul.mubr.msk.bf16.vlgmr.msra.gmra.mxu0 %vm542_vm1, %v705_v62 }
 0x56e   : > { %v3759_v0 = vpop.f32.mrf.mxu0 }
 0x570   : > { %v3761_v1 = vpop.f32.mrf.mxu0 }
 0x572   : > { %v3028_v2 = vpop.f32.mrf.mxu0 }
 0x574   : > { %v3763_v3 = vpop.f32.mrf.mxu0 }
 0x57e   : > { %v3035_v5 = vpop.f32.mrf.mxu0 }
 0x57f   : > { %v765_v9 = vadd.f32 %v3035_v5, %v3728_v16 }
 0x580   : > { %v756_v6 = vpop.f32.mrf.mxu0 }
 0x581   : > { %v757_v7 = vadd.f32 %v756_v6, %v3716_v10  ;;  %v776_v17 = vsel %vm603_vm2, %v765_v9, -inf }
 0x582   : > { %v3036_v8 = vpop.f32.mrf.mxu0 }
 0x583   : > { %v770_v11 = vsel %vm603_vm2, %v757_v7, -inf }
 0x584   : > { %v759_v12 = vpop.f32.mrf.mxu0  ;;  %771 = vmax.xlane.f32.xlu0 %v770_v11 }
 0x585   : > { %v760_v13 = vadd.f32 %v759_v12, %v3722_v14 }
 0x587   : > { %v773_v15 = vsel %vm603_vm2, %v760_v13, -inf }
 0x588   : > { %774 = vmax.xlane.f32.xlu1 %v773_v15  ;;  %777 = vmax.xlane.f32.xlu0 %v776_v17 }
 0x60d   : > { %v772_v18 = vpop.xlane.xlu0 %771 }
 0x60e   : > { %v779_v19 = vsub.f32 %v757_v7, %v772_v18 }
 0x610   : > { %v782_v20 = vmul.f32 1.442695, %v779_v19 }
 0x611   : > { %v775_v21 = vpop.xlane.xlu1 %774  ;;  %v778_v22 = vpop.xlane.xlu0 %777 }
 0x612   : > { %3351 = vpow2.f32 %v782_v20  ;;  %v780_v23 = vsub.f32 %v760_v13, %v775_v21  ;;  %v781_v24 = vsub.f32 %v765_v9, %v778_v22 }
 0x614   : > { %v784_v25 = vmul.f32 1.442695, %v780_v23  ;;  %v786_v26 = vmul.f32 1.442695, %v781_v24 }
 0x616   : > { %3353 = vpow2.f32 %v784_v25 }
 0x617   : > { %3355 = vpow2.f32 %v786_v26 }
 0x61f   : > { %v3352_v27 = vpop.eup %3351 }
 0x620   : > { %v788_v28 = vsel %vm603_vm2, %v3352_v27, 0.0 }
 0x621   : > { %789 = vadd.xlane.f32.xlu0 %v788_v28 }
 0x623   : > { %v3354_v29 = vpop.eup %3353 }
 0x624   : > { %v3356_v30 = vpop.eup %3355  ;;  %v791_v31 = vsel %vm603_vm2, %v3354_v29, 0.0 }
 0x625   : > { %792 = vadd.xlane.f32.xlu0 %v791_v31  ;;  %v794_v32 = vsel %vm603_vm2, %v3356_v30, 0.0 }
 0x626   : > { %795 = vadd.xlane.f32.xlu1 %v794_v32 }
 0x637   : > { %805 = vrot.lane.b32.xlu1 %v3701_v4, %s4275_s16 }
 0x63b   : > { %873 = vrot.lane.b32.xlu1 %v3697_v63, %s4273_s24  ;;  %807 = vrot.lane.b32.xlu0 %v3697_v63, %s4275_s16  ;;  %s4293_s16 = smov 16  }
 0x63f   : > { %871 = vrot.lane.b32.xlu1 %v3701_v4, %s4273_s24  ;;  %867 = vrot.lane.b32.xlu0 %v3701_v4, %s4269_s25 }
 0x643   : > { %869 = vrot.lane.b32.xlu1 %v3697_v63, %s4269_s25  ;;  %s4271_s25 = smov 24  }
 0x6aa   : > { %v790_v33 = vpop.xlane.xlu0 %789 }
 0x6ab   : > { %3357 = vrcp.f32 %v790_v33 }
 0x6ae   : > { %v793_v34 = vpop.xlane.xlu0 %792 }
 0x6af   : > { %v796_v35 = vpop.xlane.xlu1 %795  ;;  %3359 = vrcp.f32 %v793_v34 }
 0x6b0   : > { %3361 = vrcp.f32 %v796_v35 }
 0x6b2   : > { %v808_v36 = vpop.permute.xlu0 %807 }
 0x6b3   : > { %v806_v37 = vpop.permute.xlu1 %805  ;;  %3210 = vmatprep.subr.msk.bf16.mxu1 %vm650_vm3, %v808_v36  ;;  %v817_v38 = vsel %vm650_vm3, %v808_v36, 0 }
 0x6b4   : > { %3038 = vmatpush3.bf16.msra.mxu1 %v817_v38 }
 0x6b5   : > { %3039 = vmatprep.subr.bf16.mxu1 %v806_v37 }
 0x6b6   : > { %v868_v51 = vpop.permute.xlu0 %867 }
 0x6b7   : > { %v874_v41 = vpop.permute.xlu1 %873 }
 0x6b8   : > { %3040 = vmatpush3.bf16.msra.mxu1 %v806_v37  ;;  %v3358_v42 = vpop.eup %3357  ;;  %v885_v52 = vsel %vm542_vm1, %v874_v41, 0 }
 0x6b9   : > { %3211 = vmatprep.subr.msk.bf16.mxu1 %vm542_vm1, %v874_v41  ;;  %v800_v46 = vmul.f32 %v3358_v42, %v3352_v27 }
 0x6bb   : > { %v872_v53 = vpop.permute.xlu1 %871 }
 0x6bc   : > { %v3360_v43 = vpop.eup %3359  ;;  %v882_v57 = vsel %vm542_vm1, %v872_v53, 0 }
 0x6bd   : > { %v3362_v44 = vpop.eup %3361  ;;  %v801_v47 = vmul.f32 %v3360_v43, %v3354_v29 }
 0x6be   : > { %v802_v48 = vmul.f32 %v3362_v44, %v3356_v30 }
 0x6bf   : > { %v803_v49 = vpack.c.bf16 %v801_v47, %v800_v46  ;;  %v870_v58 = vpop.permute.xlu1 %869 }
 0x6c0   : > { %v804_v50 = vpack.c.bf16 %v802_v48, %v802_v48 }
 0x6c1   : > { %3041 = vmatprep.mubr.msk.bf16.mxu1 %vm603_vm2, %v803_v49 }
 0x6c2   : > { %3042 = vmatmul.mubr.msk.bf16.vlgmr.msra.gmra.mxu1 %vm603_vm2, %v804_v50 }
 0x6c3   : > { %3046 = vmatpush3.bf16.xpose.msra.mxu1 %v885_v52  ;;  %3049 = vmatprep.mubr.msk.bf16.mxu1 %vm542_vm1, %v868_v51 }
 0x6c4   : > { %3212 = vmatprep.subr.msk.bf16.mxu1 %vm542_vm1, %v872_v53 }
 0x6cb   : > { %3048 = vmatpush3.bf16.xpose.msra.mxu1 %v882_v57 }
 0x6d2   : > { %3050 = vmatmul.mubr.msk.bf16.vlgmr.msra.gmra.mxu1 %vm542_vm1, %v870_v58 }
 0x782   : > { %v3796_v59 = vpop.f32.mrf.mxu1 }
 0x784   : > { %v3798_v60 = vpop.f32.mrf.mxu1 }
 0x786   : > { %v3044_v61 = vpop.f32.mrf.mxu1 }
 0x788   : > { %v3800_v62 = vpop.f32.mrf.mxu1 }
 0x789   : > { %v3283_v2 = vpack.i.bf16 %v3800_v62, %v3798_v60 }
 0x792   : > { %v3051_v5 = vpop.f32.mrf.mxu1 }
 0x793   : > { %v930_v9 = vadd.f32 %v3051_v5, %v3728_v16 }
 0x794   : > { %v921_v6 = vpop.f32.mrf.mxu1 }
 0x795   : > { %v922_v7 = vadd.f32 %v921_v6, %v3716_v10  ;;  %v941_v17 = vsel %vm603_vm2, %v930_v9, -inf }
 0x796   : > { %v3052_v8 = vpop.f32.mrf.mxu1 }
 0x797   : > { %v935_v11 = vsel %vm603_vm2, %v922_v7, -inf }
 0x798   : > { %v924_v12 = vpop.f32.mrf.mxu1  ;;  %936 = vmax.xlane.f32.xlu0 %v935_v11 }
 0x799   : > { %v925_v13 = vadd.f32 %v924_v12, %v3722_v14 }
 0x79b   : > { %v938_v15 = vsel %vm603_vm2, %v925_v13, -inf }
 0x79c   : > { %939 = vmax.xlane.f32.xlu1 %v938_v15  ;;  %942 = vmax.xlane.f32.xlu0 %v941_v17 }
 0x821   : > { %v937_v18 = vpop.xlane.xlu0 %936 }
 0x822   : > { %v944_v19 = vsub.f32 %v922_v7, %v937_v18 }
 0x824   : > { %v947_v20 = vmul.f32 1.442695, %v944_v19 }
 0x825   : > { %v940_v21 = vpop.xlane.xlu1 %939  ;;  %v943_v22 = vpop.xlane.xlu0 %942 }
 0x826   : > { %3363 = vpow2.f32 %v947_v20  ;;  %v945_v23 = vsub.f32 %v925_v13, %v940_v21  ;;  %v946_v24 = vsub.f32 %v930_v9, %v943_v22 }
 0x828   : > { %v949_v25 = vmul.f32 1.442695, %v945_v23  ;;  %v951_v26 = vmul.f32 1.442695, %v946_v24 }
 0x82a   : > { %3365 = vpow2.f32 %v949_v25 }
 0x82b   : > { %3367 = vpow2.f32 %v951_v26 }
 0x833   : > { %v3364_v27 = vpop.eup %3363 }
 0x834   : > { %v953_v28 = vsel %vm603_vm2, %v3364_v27, 0.0 }
 0x835   : > { %954 = vadd.xlane.f32.xlu0 %v953_v28 }
 0x837   : > { %v3366_v29 = vpop.eup %3365 }
 0x838   : > { %v3368_v30 = vpop.eup %3367  ;;  %v956_v31 = vsel %vm603_vm2, %v3366_v29, 0.0 }
 0x839   : > { %957 = vadd.xlane.f32.xlu0 %v956_v31  ;;  %v959_v32 = vsel %vm603_vm2, %v3368_v30, 0.0 }
 0x83a   : > { %960 = vadd.xlane.f32.xlu1 %v959_v32 }
 0x84b   : > { %970 = vrot.lane.b32.xlu1 %v3701_v4, %s4267_s26 }
 0x84f   : > { %1038 = vrot.lane.b32.xlu1 %v3697_v63, %s4259_s29  ;;  %972 = vrot.lane.b32.xlu0 %v3697_v63, %s4267_s26  ;;  %s4290_s26 = smov 104  }
 0x853   : > { %1036 = vrot.lane.b32.xlu1 %v3701_v4, %s4259_s29  ;;  %1032 = vrot.lane.b32.xlu0 %v3701_v4, %s4257_s30  ;;  %s4261_s29 = smov 16  }
 0x857   : > { %1034 = vrot.lane.b32.xlu1 %v3697_v63, %s4257_s30  ;;  %s4263_s30 = smov 8  }
 0x8be   : > { %v955_v33 = vpop.xlane.xlu0 %954 }
 0x8bf   : > { %3369 = vrcp.f32 %v955_v33 }
 0x8c2   : > { %v958_v34 = vpop.xlane.xlu0 %957 }
 0x8c3   : > { %v961_v35 = vpop.xlane.xlu1 %960  ;;  %3371 = vrcp.f32 %v958_v34 }
 0x8c4   : > { %3373 = vrcp.f32 %v961_v35 }
 0x8c6   : > { %v973_v36 = vpop.permute.xlu0 %972 }
 0x8c7   : > { %v971_v37 = vpop.permute.xlu1 %970  ;;  %v982_v38 = vsel %vm650_vm3, %v973_v36, 0  ;;  %3213 = vmatprep.subr.msk.bf16.mxu0 %vm650_vm3, %v973_v36 }
 0x8c8   : > { %3054 = vmatpush3.bf16.msra.mxu0 %v982_v38 }
 0x8c9   : > { %3055 = vmatprep.subr.bf16.mxu0 %v971_v37 }
 0x8ca   : > { %v1033_v52 = vpop.permute.xlu0 %1032 }
 0x8cb   : > { %v1039_v41 = vpop.permute.xlu1 %1038 }
 0x8cc   : > { %3056 = vmatpush3.bf16.msra.mxu0 %v971_v37  ;;  %v3370_v42 = vpop.eup %3369  ;;  %v1050_v51 = vsel %vm542_vm1, %v1039_v41, 0 }
 0x8cd   : > { %3214 = vmatprep.subr.msk.bf16.mxu0 %vm542_vm1, %v1039_v41  ;;  %v965_v46 = vmul.f32 %v3370_v42, %v3364_v27 }
 0x8cf   : > { %v1037_v53 = vpop.permute.xlu1 %1036 }
 0x8d0   : > { %v3372_v43 = vpop.eup %3371  ;;  %v1047_v57 = vsel %vm542_vm1, %v1037_v53, 0 }
 0x8d1   : > { %v3374_v44 = vpop.eup %3373  ;;  %v966_v47 = vmul.f32 %v3372_v43, %v3366_v29 }
 0x8d2   : > { %v967_v48 = vmul.f32 %v3374_v44, %v3368_v30  ;;  %v3315_v44 = vld [vmem:[%s4251_s6 + $0x8] sm:$0xff]  }
 0x8d3   : > { %v968_v49 = vpack.c.bf16 %v966_v47, %v965_v46  ;;  %v1035_v58 = vpop.permute.xlu1 %1034  ;;  %v3316_v46 = vld [vmem:[%s4251_s6] sm:$0xff]  }
 0x8d4   : > { %v969_v50 = vpack.c.bf16 %v967_v48, %v967_v48 }
 0x8d5   : > { %3057 = vmatprep.mubr.msk.bf16.mxu0 %vm603_vm2, %v968_v49 }
 0x8d6   : > { %3058 = vmatmul.mubr.msk.bf16.vlgmr.msra.gmra.mxu0 %vm603_vm2, %v969_v50 }
 0x8d7   : > { %3062 = vmatpush3.bf16.xpose.msra.mxu0 %v1050_v51  ;;  %3065 = vmatprep.mubr.msk.bf16.mxu0 %vm542_vm1, %v1033_v52 }
 0x8d8   : > { %3215 = vmatprep.subr.msk.bf16.mxu0 %vm542_vm1, %v1037_v53 }
 0x8df   : > { %3064 = vmatpush3.bf16.xpose.msra.mxu0 %v1047_v57 }
 0x8e6   : > { %3066 = vmatmul.mubr.msk.bf16.vlgmr.msra.gmra.mxu0 %vm542_vm1, %v1035_v58 }
 0x996   : > { %v3059_v61 = vpop.f32.mrf.mxu0 }
 0x998   : > { %v1018_v5 = vpop.f32.mrf.mxu0 }
 0x99a   : > { %v3060_v6 = vpop.f32.mrf.mxu0 }
 0x99c   : > { %v1021_v7 = vpop.f32.mrf.mxu0 }
 0x99d   : > { %v3288_v8 = vpack.i.bf16 %v1021_v7, %v1018_v5 }
 0x9a6   : > { %v3067_v9 = vpop.f32.mrf.mxu0 }
 0x9a7   : > { %v1095_v15 = vadd.f32 %v3067_v9, %v3728_v16 }
 0x9a8   : > { %v1086_v11 = vpop.f32.mrf.mxu0 }
 0x9a9   : > { %v1087_v12 = vadd.f32 %v1086_v11, %v3716_v10  ;;  %v1106_v21 = vsel %vm603_vm2, %v1095_v15, -inf }
 0x9aa   : > { %v3068_v13 = vpop.f32.mrf.mxu0 }
 0x9ab   : > { %v1100_v17 = vsel %vm603_vm2, %v1087_v12, -inf }
 0x9ac   : > { %v1089_v18 = vpop.f32.mrf.mxu0  ;;  %1101 = vmax.xlane.f32.xlu0 %v1100_v17 }
 0x9ad   : > { %v1090_v19 = vadd.f32 %v1089_v18, %v3722_v14 }
 0x9af   : > { %v1103_v20 = vsel %vm603_vm2, %v1090_v19, -inf }
 0x9b0   : > { %1104 = vmax.xlane.f32.xlu1 %v1103_v20  ;;  %1107 = vmax.xlane.f32.xlu0 %v1106_v21 }
 0xa35   : > { %v1102_v22 = vpop.xlane.xlu0 %1101 }
 0xa36   : > { %v1109_v23 = vsub.f32 %v1087_v12, %v1102_v22 }
 0xa38   : > { %v1112_v24 = vmul.f32 1.442695, %v1109_v23 }
 0xa39   : > { %v1105_v25 = vpop.xlane.xlu1 %1104  ;;  %v1108_v10 = vpop.xlane.xlu0 %1107 }
 0xa3a   : > { %3375 = vpow2.f32 %v1112_v24  ;;  %v1110_v26 = vsub.f32 %v1090_v19, %v1105_v25  ;;  %v1111_v16 = vsub.f32 %v1095_v15, %v1108_v10 }
 0xa3c   : > { %v1114_v27 = vmul.f32 1.442695, %v1110_v26  ;;  %v1116_v28 = vmul.f32 1.442695, %v1111_v16 }
 0xa3e   : > { %3377 = vpow2.f32 %v1114_v27 }
 0xa3f   : > { %3379 = vpow2.f32 %v1116_v28 }
 0xa47   : > { %v3376_v29 = vpop.eup %3375 }
 0xa48   : > { %v1118_v14 = vsel %vm603_vm2, %v3376_v29, 0.0 }
 0xa49   : > { %1119 = vadd.xlane.f32.xlu0 %v1118_v14 }
 0xa4b   : > { %v3378_v30 = vpop.eup %3377 }
 0xa4c   : > { %v3380_v31 = vpop.eup %3379  ;;  %v1121_v32 = vsel %vm603_vm2, %v3378_v30, 0.0 }
 0xa4d   : > { %1122 = vadd.xlane.f32.xlu0 %v1121_v32  ;;  %v1124_v33 = vsel %vm603_vm2, %v3380_v31, 0.0 }
 0xa4e   : > { %1125 = vadd.xlane.f32.xlu1 %v1124_v33 }
 0xa5f   : > { %1135 = vrot.lane.b32.xlu1 %v3701_v4, %s4265_s12 }
 0xa63   : > { %3284 = vrot.lane.b32.xlu1 %v3283_v2, %s4263_s30  ;;  %1137 = vrot.lane.b32.xlu0 %v3697_v63, %s4265_s12  ;;  %s4288_s12 = smov 48  }
 0xa67   : > { %1204 = vrot.lane.b32.xlu1 %v3796_v59, %s4263_s30  ;;  %3289 = vrot.lane.b32.xlu0 %v3288_v8, %s4261_s29  ;;  %s4287_s30 = smov 112  }
 0xa6b   : > { %1216 = vrot.lane.b32.xlu1 %v3059_v61, %s4261_s29  ;;  %s4291_s29 = smov 40  }
 0xad2   : > { %v1120_v34 = vpop.xlane.xlu0 %1119 }
 0xad3   : > { %3381 = vrcp.f32 %v1120_v34 }
 0xad6   : > { %v1123_v4 = vpop.xlane.xlu0 %1122 }
 0xad7   : > { %v1126_v35 = vpop.xlane.xlu1 %1125  ;;  %3383 = vrcp.f32 %v1123_v4 }
 0xad8   : > { %3385 = vrcp.f32 %v1126_v35 }
 0xada   : > { %v1138_v36 = vpop.permute.xlu0 %1137 }
 0xadb   : > { %v1147_v60 = vsel %vm650_vm3, %v1138_v36, 0  ;;  %3216 = vmatprep.subr.msk.bf16.mxu1 %vm650_vm3, %v1138_v36  ;;  %v1136_v63 = vpop.permute.xlu1 %1135 }
 0xadc   : > { %3070 = vmatpush3.bf16.msra.mxu1 %v1147_v60 }
 0xadd   : > { %3071 = vmatprep.subr.bf16.mxu1 %v1136_v63 }
 0xade   : > { %v3290_v61 = vpop.permute.xlu0 %3289 }
 0xadf   : > { %v3285_v52 = vpop.permute.xlu1 %3284  ;;  %v3292_v6 = vunpack.i.h.bf16 %v3290_v61  ;;  %v3291_v7 = vunpack.i.l.bf16 %v3290_v61 }
 0xae0   : > { %3072 = vmatpush3.bf16.msra.mxu1 %v1136_v63  ;;  %v3382_v59 = vpop.eup %3381  ;;  %v3287_v57 = vunpack.i.h.bf16 %v3285_v52  ;;  %v3286_v58 = vunpack.i.l.bf16 %v3285_v52 }
 0xae1   : > { %v1130_v37 = vmul.f32 %v3382_v59, %v3376_v29  ;;  %3077 = vmatprep.subr.bf16.mxu1 %v3315_v44 }
 0xae2   : > { %v1234_v8 = vsel %vm542_vm1, %v3763_v3, %v3287_v57  ;;  %v1233_v9 = vsel %vm542_vm1, %v3761_v1, %v3286_v58 }
 0xae3   : > { %v1205_v53 = vpop.permute.xlu1 %1204  ;;  %v1238_v19 = vsel %vm1236_vm4, %v1234_v8, %v3292_v6  ;;  %v1237_v20 = vsel %vm1236_vm4, %v1233_v9, %v3291_v7  ;;  %v1370_v7 = vsub.s32 2, %v3669_v39 }
 0xae4   : > { %v3384_v62 = vpop.eup %3383  ;;  %v1235_v12 = vsel %vm542_vm1, %v3759_v0, %v1205_v53  ;;  %v3885_v0 = vld [vmem:[%s4255_s10] sm:$0xff] }
 0xae5   : > { %v3386_v2 = vpop.eup %3385  ;;  %v1131_v38 = vmul.f32 %v3384_v62, %v3378_v30  ;;  %v1252_v24 = vrot.slane %v3885_v0, %v3672_v40  ;;  %v1364_v6 = vrot.slane %v3885_v0, %v3679_v45 }
 0xae6   : > { %v1132_v41 = vmul.f32 %v3386_v2, %v3380_v31 }
 0xae7   : > { %v1133_v42 = vpack.c.bf16 %v1131_v38, %v1130_v37  ;;  %v1217_v5 = vpop.permute.xlu1 %1216 }
 0xae8   : > { %v1134_v43 = vpack.c.bf16 %v1132_v41, %v1132_v41  ;;  %v1239_v15 = vsel %vm1236_vm4, %v1235_v12, %v1217_v5 }
 0xae9   : > { %3073 = vmatprep.mubr.msk.bf16.mxu1 %vm603_vm2, %v1133_v42 }
 0xaea   : > { %3074 = vmatmul.mubr.msk.bf16.vlgmr.msra.gmra.mxu1 %vm603_vm2, %v1134_v43  ;;  %v3317_v43 = vld [vmem:[%s4252_s7 + $0x8] sm:$0xff]  }
 0xaeb   : > { %3078 = vmatpush3.bf16.msra.mxu1 %v3315_v44  ;;  %v3318_v44 = vld [vmem:[%s4252_s7] sm:$0xff]   ;;  %3085 = vmatprep.subr.bf16.mxu0 %v3317_v43 }
 0xaec   : > { %3079 = vmatprep.subr.bf16.mxu1 %v3316_v46  ;;  %3086 = vmatpush3.bf16.msra.mxu0 %v3317_v43 }
 0xaed   : > { %3087 = vmatprep.subr.bf16.mxu0 %v3318_v44 }
 0xaef   : > { %3080 = vmatpush3.bf16.msra.mxu1 %v3316_v46  ;;  %v3319_v46 = vld [vmem:[%s4254_s9 + $0x18] sm:$0xff]  }
 0xaf0   : > { %3088 = vmatpush3.bf16.msra.mxu0 %v3318_v44  ;;  %3093 = vmatprep.subr.bf16.mxu1 %v3319_v46 }
 0xbaa   : > { %v3075_v47 = vpop.f32.mrf.mxu1 }
 0xbab   : > { %1228 = vrot.lane.b32.xlu1 %v3075_v47, %s4271_s25 }
 0xbac   : > { %v1183_v48 = vpop.f32.mrf.mxu1 }
 0xbae   : > { %v3076_v49 = vpop.f32.mrf.mxu1 }
 0xbb0   : > { %v1186_v50 = vpop.f32.mrf.mxu1 }
 0xbb1   : > { %v3293_v51 = vpack.i.bf16 %v1186_v50, %v1183_v48 }
 0xbb3   : > { %3294 = vrot.lane.b32.xlu0 %v3293_v51, %s4271_s25  ;;  %s4284_s25 = smov 88  }
 0xc1d   : > { %v1229_v11 = vpop.permute.xlu1 %1228 }
 0xc1e   : > { %v1242_v21 = vsel %vm603_vm2, %v1239_v15, %v1229_v11  ;;  %v1371_v15 = vrot.slane %v3885_v0, %v1370_v7 }
 0xc1f   : > { %v1244_v23 = vpack.c.bf16 %v1242_v21, %v1242_v21 }
 0xc25   : > { %v3295_v13 = vpop.permute.xlu0 %3294 }
 0xc26   : > { %v3297_v17 = vunpack.i.h.bf16 %v3295_v13  ;;  %v3296_v18 = vunpack.i.l.bf16 %v3295_v13 }
 0xc28   : > { %v1240_v3 = vsel %vm603_vm2, %v1237_v20, %v3296_v18  ;;  %v1241_v1 = vsel %vm603_vm2, %v1238_v19, %v3297_v17 }
 0xc29   : > { %v1243_v22 = vpack.c.bf16 %v1241_v1, %v1240_v3 }
 0xc2b   : > { %3081 = vmatprep.mubr.msk.bf16.mxu1 %vm396_vm0, %v1243_v22  ;;  %v3320_v22 = vld [vmem:[%s4254_s9 + $0x10] sm:$0xff]  }
 0xc2c   : > { %3082 = vmatmul.mubr.msk.bf16.vlgmr.msra.gmra.mxu1 %vm396_vm0, %v1244_v23  ;;  %v3321_v23 = vld [vmem:[%s4254_s9 + $0x8] sm:$0xff]  }
 0xc2d   : > { %3094 = vmatpush3.bf16.msra.mxu1 %v3319_v46 }
 0xc2e   : > { %3095 = vmatprep.subr.bf16.mxu1 %v3320_v22 }
 0xc31   : > { %3096 = vmatpush3.bf16.msra.mxu1 %v3320_v22 }
 0xc32   : > { %3097 = vmatprep.subr.bf16.mxu1 %v3321_v23 }
 0xc35   : > { %3098 = vmatpush3.bf16.msra.mxu1 %v3321_v23 }
 0xcec   : > { %v3083_v25 = vpop.f32.mrf.mxu1 }
 0xced   : > { %v1314_v26 = vadd.f32 %v3083_v25, %v1252_v24 }
 0xcee   : > { %v1305_v10 = vpop.f32.mrf.mxu1 }
 0xcef   : > { %v1306_v16 = vadd.f32 %v1305_v10, %v1252_v24  ;;  %v1321_v31 = vadd.f32 %v1314_v26, %v3682_v54  ;;  %v2831_v10 = vld [vmem:[%s4253_s8] ss:$0 sm:$0xff] }
 0xcf0   : > { %v3084_v27 = vpop.f32.mrf.mxu1 }
 0xcf1   : > { %v1319_v28 = vadd.f32 %v1306_v16, %v3684_v55  ;;  %v1328_v34 = vsel %vm396_vm0, %v1321_v31, 0.0 }
 0xcf2   : > { %v1308_v29 = vpop.f32.mrf.mxu1 }
 0xcf3   : > { %v1309_v14 = vadd.f32 %v1308_v29, %v1252_v24  ;;  %v1322_v30 = vsel %vm396_vm0, %v1319_v28, 0.0  ;;  %v3322_v24 = vld [vmem:[%s4254_s9] sm:$0xff]  }
 0xcf4   : > { %1323 = vadd.xlane.f32.xlu0 %v1322_v30  ;;  %3099 = vmatprep.subr.bf16.mxu1 %v3322_v24 }
 0xcf5   : > { %v1320_v32 = vadd.f32 %v1309_v14, %v3686_v56  ;;  %3100 = vmatpush3.bf16.msra.mxu1 %v3322_v24  ;;  %v1601_v24 = vsub.s32 5, %v3669_v39 }
 0xcf7   : > { %v1325_v33 = vsel %vm396_vm0, %v1320_v32, 0.0 }
 0xcf8   : > { %1326 = vadd.xlane.f32.xlu1 %v1325_v33  ;;  %1329 = vadd.xlane.f32.xlu0 %v1328_v34 }
 0xd7d   : > { %v1324_v4 = vpop.xlane.xlu0 %1323 }
 0xd7e   : > { %v1331_v35 = vmul.f32 0.03125, %v1324_v4  ;;  %v1469_v4 = vsub.s32 3, %v3669_v39 }
 0xd80   : > { %v1334_v36 = vsub.f32 %v1319_v28, %v1331_v35  ;;  %v1470_v35 = vrot.slane %v3885_v0, %v1469_v4 }
 0xd81   : > { %v1327_v60 = vpop.xlane.xlu1 %1326  ;;  %v1330_v55 = vpop.xlane.xlu0 %1329 }
 0xd82   : > { %v1332_v63 = vmul.f32 0.03125, %v1327_v60  ;;  %v1333_v59 = vmul.f32 0.03125, %v1330_v55  ;;  %v1337_v62 = vmul.f32 %v1334_v36, %v1334_v36 }
 0xd84   : > { %v1335_v2 = vsub.f32 %v1320_v32, %v1332_v63  ;;  %v1336_v37 = vsub.f32 %v1321_v31, %v1333_v59  ;;  %v1340_v54 = vsel %vm396_vm0, %v1337_v62, 0.0 }
 0xd85   : > { %1341 = vadd.xlane.f32.xlu0 %v1340_v54 }
 0xd86   : > { %v1338_v56 = vmul.f32 %v1335_v2, %v1335_v2  ;;  %v1339_v38 = vmul.f32 %v1336_v37, %v1336_v37 }
 0xd88   : > { %v1343_v41 = vsel %vm396_vm0, %v1338_v56, 0.0  ;;  %v1346_v42 = vsel %vm396_vm0, %v1339_v38, 0.0 }
 0xd89   : > { %1344 = vadd.xlane.f32.xlu0 %v1343_v41  ;;  %1347 = vadd.xlane.f32.xlu1 %v1346_v42 }
 0xe0e   : > { %v1342_v47 = vpop.xlane.xlu0 %1341 }
 0xe0f   : > { %v1349_v48 = vmul.f32 0.03125, %v1342_v47 }
 0xe11   : > { %v1352_v49 = vadd.f32 1e-05, %v1349_v48 }
 0xe12   : > { %v1348_v50 = vpop.xlane.xlu1 %1347  ;;  %v1345_v51 = vpop.xlane.xlu0 %1344 }
 0xe13   : > { %3387 = vrsqrt.f32 %v1352_v49  ;;  %v1351_v52 = vmul.f32 0.03125, %v1348_v50  ;;  %v1350_v53 = vmul.f32 0.03125, %v1345_v51 }
 0xe15   : > { %v1354_v57 = vadd.f32 1e-05, %v1351_v52  ;;  %v1353_v58 = vadd.f32 1e-05, %v1350_v53 }
 0xe17   : > { %3389 = vrsqrt.f32 %v1354_v57 }
 0xe18   : > { %3391 = vrsqrt.f32 %v1353_v58 }
 0xe20   : > { %v3388_v61 = vpop.eup %3387 }
 0xe21   : > { %v1358_v5 = vmul.f32 %v3388_v61, %v1334_v36 }
 0xe23   : > { %v1365_v13 = vmul.f32 %v1364_v6, %v1358_v5 }
 0xe24   : > { %v3390_v8 = vpop.eup %3389 }
 0xe25   : > { %v3392_v9 = vpop.eup %3391  ;;  %v1360_v11 = vmul.f32 %v3390_v8, %v1336_v37  ;;  %v1372_v20 = vadd.f32 %v1371_v15, %v1365_v13  ;;  %v3323_v8 = vld [vmem:[%s4249_s4 + $0x18] sm:$0xff]  }
 0xe26   : > { %v1359_v12 = vmul.f32 %v3392_v9, %v1335_v2  ;;  %v3324_v9 = vld [vmem:[%s4249_s4 + $0x10] sm:$0xff]   ;;  %3105 = vmatprep.subr.bf16.mxu0 %v3323_v8 }
 0xe27   : > { %v1367_v17 = vmul.f32 %v1364_v6, %v1360_v11 }
 0xe28   : > { %v1366_v18 = vmul.f32 %v1364_v6, %v1359_v12 }
 0xe29   : > { %v1374_v19 = vadd.f32 %v1371_v15, %v1367_v17 }
 0xe2a   : > { %v1373_v21 = vadd.f32 %v1371_v15, %v1366_v18 }
 0xe2b   : > { %v1376_v3 = vpack.c.bf16 %v1374_v19, %v1374_v19 }
 0xe2c   : > { %v1375_v1 = vpack.c.bf16 %v1373_v21, %v1372_v20 }
 0xe2e   : > { %3089 = vmatprep.mubr.msk.bf16.mxu0 %vm396_vm0, %v1375_v1 }
 0xe2f   : > { %3090 = vmatmul.mubr.msk.bf16.vlgmr.msra.gmra.mxu0 %vm396_vm0, %v1376_v3  ;;  %v1594_v3 = vsub.s32 4, %v3669_v39 }
 0xe30   : > { %3106 = vmatpush3.bf16.msra.mxu0 %v3323_v8 }
 0xe31   : > { %3107 = vmatprep.subr.bf16.mxu0 %v3324_v9  ;;  %v1595_v23 = vrot.slane %v3885_v0, %v1594_v3 }
 0xe34   : > { %3108 = vmatpush3.bf16.msra.mxu0 %v3324_v9 }
 0xeef   : > { %v3091_v25 = vpop.f32.mrf.mxu0 }
 0xef0   : > { %v1449_v16 = vadd.f32 %v3091_v25, %v2831_v10 }
 0xef1   : > { %v1440_v26 = vpop.f32.mrf.mxu0 }
 0xef2   : > { %v1441_v28 = vadd.f32 %v2831_v10, %v1440_v26  ;;  %v1456_v30 = vmax.f32 %v1449_v16, 0.0 }
 0xef3   : > { %v3092_v27 = vpop.f32.mrf.mxu0 }
 0xef4   : > { %v1454_v31 = vmax.f32 %v1441_v28, 0.0  ;;  %v1458_v34 = vpack.c.bf16 %v1456_v30, %v1456_v30  ;;  %v1602_v28 = vrot.slane %v3885_v0, %v1601_v24  ;;  %v2848_v0 = vld [vmem:[%s4250_s5 + $0x1] ss:$0 sm:$0xff] }
 0xef5   : > { %v1443_v29 = vpop.f32.mrf.mxu0 }
 0xef6   : > { %v1444_v14 = vadd.f32 %v2831_v10, %v1443_v29 }
 0xef8   : > { %v1455_v32 = vmax.f32 %v1444_v14, 0.0 }
 0xefa   : > { %v1457_v33 = vpack.c.bf16 %v1455_v32, %v1454_v31 }
 0xefc   : > { %3101 = vmatprep.mubr.msk.bf16.mxu1 %vm1495_vm5, %v1457_v33 }
 0xefd   : > { %3102 = vmatmul.mubr.msk.bf16.vlgmr.msra.gmra.mxu1 %vm1495_vm5, %v1458_v34 }
 0xfbd   : > { %v3103_v36 = vpop.f32.mrf.mxu1 }
 0xfbe   : > { %v1545_v55 = vadd.f32 %v3103_v36, %v1470_v35 }
 0xfbf   : > { %v1536_v60 = vpop.f32.mrf.mxu1 }
 0xfc0   : > { %v1537_v63 = vadd.f32 %v1536_v60, %v1470_v35  ;;  %v1552_v56 = vadd.f32 %v1545_v55, %v1374_v19 }
 0xfc1   : > { %v3104_v59 = vpop.f32.mrf.mxu1 }
 0xfc2   : > { %v1550_v62 = vadd.f32 %v1537_v63, %v1372_v20  ;;  %v1559_v42 = vsel %vm396_vm0, %v1552_v56, 0.0 }
 0xfc3   : > { %v1539_v2 = vpop.f32.mrf.mxu1 }
 0xfc4   : > { %v1540_v37 = vadd.f32 %v1539_v2, %v1470_v35  ;;  %v1553_v54 = vsel %vm396_vm0, %v1550_v62, 0.0 }
 0xfc5   : > { %1554 = vadd.xlane.f32.xlu0 %v1553_v54 }
 0xfc6   : > { %v1551_v38 = vadd.f32 %v1540_v37, %v1373_v21 }
 0xfc8   : > { %v1556_v41 = vsel %vm396_vm0, %v1551_v38, 0.0 }
 0xfc9   : > { %1557 = vadd.xlane.f32.xlu1 %v1556_v41  ;;  %1560 = vadd.xlane.f32.xlu0 %v1559_v42 }
0x104e   : > { %v1555_v43 = vpop.xlane.xlu0 %1554 }
0x104f   : > { %v1562_v44 = vmul.f32 0.03125, %v1555_v43 }
0x1051   : > { %v1565_v46 = vsub.f32 %v1550_v62, %v1562_v44  ;;  %v3987_v44 = vld [vmem:[%s4247_s2] sm:$0xff] }
0x1052   : > { %v1558_v47 = vpop.xlane.xlu1 %1557  ;;  %v1561_v48 = vpop.xlane.xlu0 %1560 }
0x1053   : > { %v1563_v49 = vmul.f32 0.03125, %v1558_v47  ;;  %v1564_v50 = vmul.f32 0.03125, %v1561_v48  ;;  %v1568_v51 = vmul.f32 %v1565_v46, %v1565_v46 }
0x1055   : > { %v1566_v52 = vsub.f32 %v1551_v38, %v1563_v49  ;;  %v1567_v53 = vsub.f32 %v1552_v56, %v1564_v50  ;;  %v1571_v57 = vsel %vm396_vm0, %v1568_v51, 0.0  ;;  %v3994_v50 = vld [vmem:[%s4247_s2 + $0x8] sm:$0xff] }
0x1056   : > { %1572 = vadd.xlane.f32.xlu1 %v1571_v57 }
0x1057   : > { %v1569_v58 = vmul.f32 %v1566_v52, %v1566_v52  ;;  %v1570_v61 = vmul.f32 %v1567_v53, %v1567_v53 }
0x1059   : > { %v1574_v5 = vsel %vm396_vm0, %v1569_v58, 0.0  ;;  %v1577_v6 = vsel %vm396_vm0, %v1570_v61, 0.0 }
0x105a   : > { %1575 = vadd.xlane.f32.xlu0 %v1574_v5  ;;  %1578 = vadd.xlane.f32.xlu1 %v1577_v6 }
0x10df   : > { %v1573_v11 = vpop.xlane.xlu1 %1572 }
0x10e0   : > { %v1580_v12 = vmul.f32 0.03125, %v1573_v11 }
0x10e2   : > { %v1583_v13 = vadd.f32 1e-05, %v1580_v12 }
0x10e3   : > { %v1579_v15 = vpop.xlane.xlu1 %1578  ;;  %v1576_v17 = vpop.xlane.xlu0 %1575 }
0x10e4   : > { %3393 = vrsqrt.f32 %v1583_v13  ;;  %v1582_v18 = vmul.f32 0.03125, %v1579_v15  ;;  %v1581_v19 = vmul.f32 0.03125, %v1576_v17 }
0x10e6   : > { %v1585_v20 = vadd.f32 1e-05, %v1582_v18  ;;  %v1584_v21 = vadd.f32 1e-05, %v1581_v19 }
0x10e8   : > { %3395 = vrsqrt.f32 %v1585_v20 }
0x10e9   : > { %3397 = vrsqrt.f32 %v1584_v21 }
0x10f1   : > { %v3394_v1 = vpop.eup %3393 }
0x10f2   : > { %v1589_v22 = vmul.f32 %v3394_v1, %v1565_v46 }
0x10f4   : > { %v1596_v27 = vmul.f32 %v1595_v23, %v1589_v22 }
0x10f5   : > { %v3396_v25 = vpop.eup %3395 }
0x10f6   : > { %v3398_v10 = vpop.eup %3397  ;;  %v1591_v26 = vmul.f32 %v3396_v25, %v1567_v53  ;;  %v3955_v31 = vadd.f32 %v1602_v28, %v1596_v27 }
0x10f7   : > { %v1590_v16 = vmul.f32 %v3398_v10, %v1566_v52  ;;  %v4000_v52 = vld [vmem:[%s4247_s2 + $0x10] sm:$0xff] }
0x10f8   : > { %v1598_v29 = vmul.f32 %v1595_v23, %v1591_v26 }
0x10f9   : > { %v1597_v14 = vmul.f32 %v1595_v23, %v1590_v16 }
0x10fa   : > { %v3953_v30 = vadd.f32 %v1602_v28, %v1598_v29 }
0x10fb   : > { %v3957_v32 = vadd.f32 %v1602_v28, %v1597_v14 }
0x10fc   : > { %v1611_v33 = vpack.c.bf16 %v3953_v30, %v3953_v30 }
0x10fd   : > { %v1610_v34 = vpack.c.bf16 %v3957_v32, %v3955_v31 }
0x10ff   : > { %3109 = vmatprep.mubr.msk.bf16.mxu0 %vm396_vm0, %v1610_v34 }
0x1100   : > { %3110 = vmatmul.mubr.msk.bf16.vlgmr.msra.gmra.mxu0 %vm396_vm0, %v1611_v33 }
0x11c0   : > { %v3111_v35 = vpop.f32.mrf.mxu0 }
0x11c1   : > { %v1684_v36 = vadd.f32 %v3111_v35, %v2848_v0 }
0x11c2   : > { %v1675_v60 = vpop.f32.mrf.mxu0 }
0x11c3   : > { %v3968_v55 = vpack.c.bf16 %v1684_v36, %v1684_v36  ;;  %v1676_v62 = vadd.f32 %v2848_v0, %v1675_v60 }
0x11c4   : > { %v3112_v63 = vpop.f32.mrf.mxu0 }
0x11c5   : > { %1695 = vrot.lane.b32.xlu0 %v3968_v55, %s3520_s22 }
0x11c6   : > { %v1678_v59 = vpop.f32.mrf.mxu0 }
0x11c7   : > { %v1679_v2 = vadd.f32 %v2848_v0, %v1678_v59 }
0x11c9   : > { %v3972_v37 = vpack.c.bf16 %v1679_v2, %v1676_v62 }
0x11cb   : > { %1693 = vrot.lane.b32.xlu1 %v3972_v37, %s3520_s22  ;;  %3117 = vmatprep.mubr.msk.bf16.mxu0 %vm542_vm1, %v3972_v37  ;;  %s4289_s22 = smov 72  }
0x1237   : > { %v1696_v54 = vpop.permute.xlu0 %1695 }
0x1238   : > { %v1707_v56 = vsel %vm542_vm1, %v1696_v54, 0  ;;  %3217 = vmatprep.subr.msk.bf16.mxu0 %vm542_vm1, %v1696_v54 }
0x1239   : > { %3114 = vmatpush3.bf16.xpose.msra.mxu0 %v1707_v56 }
0x123d   : > { %v1694_v38 = vpop.permute.xlu1 %1693 }
0x123e   : > { %3218 = vmatprep.subr.msk.bf16.mxu0 %vm542_vm1, %v1694_v38  ;;  %v1704_v41 = vsel %vm542_vm1, %v1694_v38, 0 }
0x1241   : > { %3116 = vmatpush3.bf16.xpose.msra.mxu0 %v1704_v41 }
0x1248   : > { %3118 = vmatmul.mubr.msk.bf16.vlgmr.msra.gmra.mxu0 %vm542_vm1, %v3968_v55 }
0x1308   : > { %v3119_v42 = vpop.f32.mrf.mxu0 }
0x1309   : > { %v1752_v53 = vadd.f32 %v4000_v52, %v3119_v42 }
0x130a   : > { %v1743_v43 = vpop.f32.mrf.mxu0 }
0x130b   : > { %v1744_v46 = vadd.f32 %v3987_v44, %v1743_v43  ;;  %v1763_v58 = vsel %vm603_vm2, %v1752_v53, -inf }
0x130c   : > { %v3120_v47 = vpop.f32.mrf.mxu0 }
0x130d   : > { %v1757_v48 = vsel %vm603_vm2, %v1744_v46, -inf }
0x130e   : > { %v1746_v49 = vpop.f32.mrf.mxu0  ;;  %1758 = vmax.xlane.f32.xlu1 %v1757_v48 }
0x130f   : > { %v1747_v51 = vadd.f32 %v3994_v50, %v1746_v49 }
0x1311   : > { %v1760_v57 = vsel %vm603_vm2, %v1747_v51, -inf }
0x1312   : > { %1761 = vmax.xlane.f32.xlu0 %v1760_v57 }
0x1316   : > { %1764 = vmax.xlane.f32.xlu0 %v1763_v58 }
0x1397   : > { %v1759_v61 = vpop.xlane.xlu1 %1758 }
0x1398   : > { %v1766_v8 = vsub.f32 %v1744_v46, %v1759_v61 }
0x139a   : > { %v1769_v13 = vmul.f32 1.442695, %v1766_v8 }
0x139b   : > { %v1762_v5 = vpop.xlane.xlu0 %1761 }
0x139c   : > { %v1767_v6 = vsub.f32 %v1747_v51, %v1762_v5 }
0x139e   : > { %v1771_v9 = vmul.f32 1.442695, %v1767_v6 }
0x139f   : > { %v1765_v11 = vpop.xlane.xlu0 %1764 }
0x13a0   : > { %3399 = vpow2.f32 %v1771_v9  ;;  %v1768_v12 = vsub.f32 %v1752_v53, %v1765_v11 }
0x13a2   : > { %v1773_v15 = vmul.f32 1.442695, %v1768_v12 }
0x13a4   : > { %3401 = vpow2.f32 %v1773_v15 }
0x13a5   : > { %3403 = vpow2.f32 %v1769_v13 }
0x13ad   : > { %v3400_v17 = vpop.eup %3399 }
0x13ae   : > { %v1778_v18 = vsel %vm603_vm2, %v3400_v17, 0.0 }
0x13af   : > { %1779 = vadd.xlane.f32.xlu0 %v1778_v18 }
0x13b1   : > { %v3402_v19 = vpop.eup %3401 }
0x13b2   : > { %v1781_v20 = vsel %vm603_vm2, %v3402_v19, 0.0  ;;  %v3404_v21 = vpop.eup %3403 }
0x13b3   : > { %1782 = vadd.xlane.f32.xlu1 %v1781_v20  ;;  %v1775_v1 = vsel %vm603_vm2, %v3404_v21, 0.0 }
0x13b7   : > { %1776 = vadd.xlane.f32.xlu1 %v1775_v1 }
0x13c5   : > { %1794 = vrot.lane.b32.xlu0 %v3968_v55, %s3521_s13 }
0x13c8   : > { %1792 = vrot.lane.b32.xlu1 %v3972_v37, %s3521_s13  ;;  %s4285_s13 = smov 56  }
0x13c9   : > { %1854 = vrot.lane.b32.xlu0 %v3972_v37, %s3522_s14 }
0x13cc   : > { %1860 = vrot.lane.b32.xlu1 %v3968_v55, %s4284_s25 }
0x13d0   : > { %1858 = vrot.lane.b32.xlu1 %v3972_v37, %s4284_s25  ;;  %s2902_s25 = sshll.u32 %s3616_s21, 7 }
0x13d4   : > { %1856 = vrot.lane.b32.xlu1 %v3968_v55, %s3522_s14  ;;  %s4286_s14 = smov 80  }
0x1438   : > { %v1780_v22 = vpop.xlane.xlu0 %1779 }
0x143c   : > { %v1795_v23 = vpop.permute.xlu0 %1794  ;;  %v1783_v25 = vpop.xlane.xlu1 %1782 }
0x143d   : > { %v1804_v10 = vsel %vm650_vm3, %v1795_v23, 0  ;;  %3219 = vmatprep.subr.msk.bf16.mxu1 %vm650_vm3, %v1795_v23  ;;  %3405 = vrcp.f32 %v1783_v25 }
0x143e   : > { %3122 = vmatpush3.bf16.msra.mxu1 %v1804_v10  ;;  %3407 = vrcp.f32 %v1780_v22 }
0x1440   : > { %v1777_v26 = vpop.xlane.xlu1 %1776  ;;  %v1855_v60 = vpop.permute.xlu0 %1854 }
0x1441   : > { %3409 = vrcp.f32 %v1777_v26 }
0x1444   : > { %v1793_v16 = vpop.permute.xlu1 %1792 }
0x1445   : > { %3123 = vmatprep.subr.bf16.mxu1 %v1793_v16 }
0x1446   : > { %3124 = vmatpush3.bf16.msra.mxu1 %v1793_v16 }
0x1448   : > { %v1861_v27 = vpop.permute.xlu1 %1860 }
0x1449   : > { %3220 = vmatprep.subr.msk.bf16.mxu1 %vm542_vm1, %v1861_v27  ;;  %v1872_v63 = vsel %vm542_vm1, %v1861_v27, 0 }
0x144a   : > { %v3406_v28 = vpop.eup %3405 }
0x144b   : > { %v3408_v29 = vpop.eup %3407  ;;  %v1789_v33 = vmul.f32 %v3406_v28, %v3402_v19 }
0x144c   : > { %v1788_v0 = vmul.f32 %v3408_v29, %v3400_v17  ;;  %v1859_v59 = vpop.permute.xlu1 %1858 }
0x144d   : > { %v1791_v36 = vpack.c.bf16 %v1789_v33, %v1789_v33  ;;  %v1869_v62 = vsel %vm542_vm1, %v1859_v59, 0 }
0x144e   : > { %v3410_v14 = vpop.eup %3409 }
0x144f   : > { %v1787_v34 = vmul.f32 %v3410_v14, %v3404_v21 }
0x1450   : > { %v1857_v2 = vpop.permute.xlu1 %1856 }
0x1451   : > { %v1790_v35 = vpack.c.bf16 %v1788_v0, %v1787_v34 }
0x1453   : > { %3125 = vmatprep.mubr.msk.bf16.mxu1 %vm603_vm2, %v1790_v35 }
0x1454   : > { %3126 = vmatmul.mubr.msk.bf16.vlgmr.msra.gmra.mxu1 %vm603_vm2, %v1791_v36 }
0x1455   : > { %3130 = vmatpush3.bf16.xpose.msra.mxu1 %v1872_v63  ;;  %3133 = vmatprep.mubr.msk.bf16.mxu1 %vm542_vm1, %v1855_v60 }
0x1456   : > { %3221 = vmatprep.subr.msk.bf16.mxu1 %vm542_vm1, %v1859_v59 }
0x145d   : > { %3132 = vmatpush3.bf16.xpose.msra.mxu1 %v1869_v62 }
0x1464   : > { %3134 = vmatmul.mubr.msk.bf16.vlgmr.msra.gmra.mxu1 %vm542_vm1, %v1857_v2 }
0x1514   : > { %v4030_v54 = vpop.f32.mrf.mxu1 }
0x1516   : > { %v4032_v56 = vpop.f32.mrf.mxu1 }
0x1518   : > { %v3128_v38 = vpop.f32.mrf.mxu1 }
0x151a   : > { %v4034_v41 = vpop.f32.mrf.mxu1 }
0x1524   : > { %v3135_v42 = vpop.f32.mrf.mxu1 }
0x1525   : > { %v1917_v48 = vadd.f32 %v4000_v52, %v3135_v42 }
0x1526   : > { %v1908_v43 = vpop.f32.mrf.mxu1 }
0x1527   : > { %v1909_v46 = vadd.f32 %v3987_v44, %v1908_v43  ;;  %v1928_v58 = vsel %vm603_vm2, %v1917_v48, -inf }
0x1528   : > { %v3136_v47 = vpop.f32.mrf.mxu1 }
0x1529   : > { %v1922_v49 = vsel %vm603_vm2, %v1909_v46, -inf }
0x152a   : > { %v1911_v51 = vpop.f32.mrf.mxu1  ;;  %1923 = vmax.xlane.f32.xlu0 %v1922_v49 }
0x152b   : > { %v1912_v53 = vadd.f32 %v3994_v50, %v1911_v51 }
0x152d   : > { %v1925_v57 = vsel %vm603_vm2, %v1912_v53, -inf }
0x152e   : > { %1926 = vmax.xlane.f32.xlu1 %v1925_v57  ;;  %1929 = vmax.xlane.f32.xlu0 %v1928_v58 }
0x15b3   : > { %v1924_v61 = vpop.xlane.xlu0 %1923 }
0x15b4   : > { %v1931_v5 = vsub.f32 %v1909_v46, %v1924_v61 }
0x15b6   : > { %v1934_v6 = vmul.f32 1.442695, %v1931_v5 }
0x15b7   : > { %v1927_v8 = vpop.xlane.xlu1 %1926  ;;  %v1930_v9 = vpop.xlane.xlu0 %1929 }
0x15b8   : > { %3411 = vpow2.f32 %v1934_v6  ;;  %v1932_v11 = vsub.f32 %v1912_v53, %v1927_v8  ;;  %v1933_v12 = vsub.f32 %v1917_v48, %v1930_v9 }
0x15ba   : > { %v1936_v13 = vmul.f32 1.442695, %v1932_v11  ;;  %v1938_v15 = vmul.f32 1.442695, %v1933_v12 }
0x15bc   : > { %3413 = vpow2.f32 %v1936_v13 }
0x15bd   : > { %3415 = vpow2.f32 %v1938_v15 }
0x15c5   : > { %v3412_v17 = vpop.eup %3411 }
0x15c6   : > { %v1940_v18 = vsel %vm603_vm2, %v3412_v17, 0.0 }
0x15c7   : > { %1941 = vadd.xlane.f32.xlu0 %v1940_v18 }
0x15c9   : > { %v3414_v19 = vpop.eup %3413 }
0x15ca   : > { %v3416_v20 = vpop.eup %3415  ;;  %v1943_v21 = vsel %vm603_vm2, %v3414_v19, 0.0 }
0x15cb   : > { %1944 = vadd.xlane.f32.xlu0 %v1943_v21  ;;  %v1946_v1 = vsel %vm603_vm2, %v3416_v20, 0.0 }
0x15cc   : > { %1947 = vadd.xlane.f32.xlu1 %v1946_v1 }
0x15dd   : > { %1957 = vrot.lane.b32.xlu1 %v3972_v37, %s4285_s13 }
0x15e1   : > { %2025 = vrot.lane.b32.xlu1 %v3968_v55, %s4286_s14  ;;  %1959 = vrot.lane.b32.xlu0 %v3968_v55, %s4285_s13 }
0x15e5   : > { %2023 = vrot.lane.b32.xlu1 %v3972_v37, %s4286_s14  ;;  %2019 = vrot.lane.b32.xlu0 %v3972_v37, %s4287_s30 }
0x15e9   : > { %2021 = vrot.lane.b32.xlu1 %v3968_v55, %s4287_s30  ;;  %s4294_s30 = smov 24  }
0x1650   : > { %v1942_v22 = vpop.xlane.xlu0 %1941 }
0x1651   : > { %3417 = vrcp.f32 %v1942_v22 }
0x1654   : > { %v1945_v23 = vpop.xlane.xlu0 %1944 }
0x1655   : > { %v1948_v25 = vpop.xlane.xlu1 %1947  ;;  %3419 = vrcp.f32 %v1945_v23 }
0x1656   : > { %3421 = vrcp.f32 %v1948_v25 }
0x1658   : > { %v1960_v10 = vpop.permute.xlu0 %1959 }
0x1659   : > { %v1958_v26 = vpop.permute.xlu1 %1957  ;;  %v1969_v16 = vsel %vm650_vm3, %v1960_v10, 0  ;;  %3222 = vmatprep.subr.msk.bf16.mxu0 %vm650_vm3, %v1960_v10 }
0x165a   : > { %3138 = vmatpush3.bf16.msra.mxu0 %v1969_v16 }
0x165b   : > { %3139 = vmatprep.subr.bf16.mxu0 %v1958_v26 }
0x165c   : > { %v2020_v63 = vpop.permute.xlu0 %2019 }
0x165d   : > { %v2026_v27 = vpop.permute.xlu1 %2025 }
0x165e   : > { %3140 = vmatpush3.bf16.msra.mxu0 %v1958_v26  ;;  %v3418_v28 = vpop.eup %3417  ;;  %v2037_v60 = vsel %vm542_vm1, %v2026_v27, 0 }
0x165f   : > { %3223 = vmatprep.subr.msk.bf16.mxu0 %vm542_vm1, %v2026_v27  ;;  %v1952_v33 = vmul.f32 %v3418_v28, %v3412_v17 }
0x1661   : > { %v2024_v59 = vpop.permute.xlu1 %2023 }
0x1662   : > { %v3420_v29 = vpop.eup %3419  ;;  %v2034_v62 = vsel %vm542_vm1, %v2024_v59, 0 }
0x1663   : > { %v3422_v14 = vpop.eup %3421  ;;  %v1953_v34 = vmul.f32 %v3420_v29, %v3414_v19 }
0x1664   : > { %v1954_v0 = vmul.f32 %v3422_v14, %v3416_v20 }
0x1665   : > { %v1955_v35 = vpack.c.bf16 %v1953_v34, %v1952_v33  ;;  %v2022_v2 = vpop.permute.xlu1 %2021 }
0x1666   : > { %v1956_v36 = vpack.c.bf16 %v1954_v0, %v1954_v0 }
0x1667   : > { %3141 = vmatprep.mubr.msk.bf16.mxu0 %vm603_vm2, %v1955_v35 }
0x1668   : > { %3142 = vmatmul.mubr.msk.bf16.vlgmr.msra.gmra.mxu0 %vm603_vm2, %v1956_v36 }
0x1669   : > { %3146 = vmatpush3.bf16.xpose.msra.mxu0 %v2037_v60  ;;  %3149 = vmatprep.mubr.msk.bf16.mxu0 %vm542_vm1, %v2020_v63 }
0x166a   : > { %3224 = vmatprep.subr.msk.bf16.mxu0 %vm542_vm1, %v2024_v59 }
0x1671   : > { %3148 = vmatpush3.bf16.xpose.msra.mxu0 %v2034_v62 }
0x1678   : > { %3150 = vmatmul.mubr.msk.bf16.vlgmr.msra.gmra.mxu0 %vm542_vm1, %v2022_v2 }
0x1728   : > { %v4067_v38 = vpop.f32.mrf.mxu0 }
0x172a   : > { %v4069_v42 = vpop.f32.mrf.mxu0 }
0x172c   : > { %v3144_v43 = vpop.f32.mrf.mxu0 }
0x172e   : > { %v4071_v46 = vpop.f32.mrf.mxu0 }
0x172f   : > { %v3298_v47 = vpack.i.bf16 %v4071_v46, %v4069_v42 }
0x1738   : > { %v3151_v48 = vpop.f32.mrf.mxu0 }
0x1739   : > { %v2082_v57 = vadd.f32 %v4000_v52, %v3151_v48 }
0x173a   : > { %v2073_v49 = vpop.f32.mrf.mxu0 }
0x173b   : > { %v2074_v51 = vadd.f32 %v3987_v44, %v2073_v49  ;;  %v2093_v8 = vsel %vm603_vm2, %v2082_v57, -inf }
0x173c   : > { %v3152_v53 = vpop.f32.mrf.mxu0 }
0x173d   : > { %v2087_v58 = vsel %vm603_vm2, %v2074_v51, -inf }
0x173e   : > { %v2076_v61 = vpop.f32.mrf.mxu0  ;;  %2088 = vmax.xlane.f32.xlu0 %v2087_v58 }
0x173f   : > { %v2077_v5 = vadd.f32 %v3994_v50, %v2076_v61 }
0x1741   : > { %v2090_v6 = vsel %vm603_vm2, %v2077_v5, -inf }
0x1742   : > { %2091 = vmax.xlane.f32.xlu1 %v2090_v6  ;;  %2094 = vmax.xlane.f32.xlu0 %v2093_v8 }
0x17c7   : > { %v2089_v9 = vpop.xlane.xlu0 %2088 }
0x17c8   : > { %v2096_v11 = vsub.f32 %v2074_v51, %v2089_v9 }
0x17ca   : > { %v2099_v12 = vmul.f32 1.442695, %v2096_v11 }
0x17cb   : > { %v2092_v13 = vpop.xlane.xlu1 %2091  ;;  %v2095_v15 = vpop.xlane.xlu0 %2094 }
0x17cc   : > { %3423 = vpow2.f32 %v2099_v12  ;;  %v2097_v17 = vsub.f32 %v2077_v5, %v2092_v13  ;;  %v2098_v18 = vsub.f32 %v2082_v57, %v2095_v15 }
0x17ce   : > { %v2101_v19 = vmul.f32 1.442695, %v2097_v17  ;;  %v2103_v20 = vmul.f32 1.442695, %v2098_v18 }
0x17d0   : > { %3425 = vpow2.f32 %v2101_v19 }
0x17d1   : > { %3427 = vpow2.f32 %v2103_v20 }
0x17d9   : > { %v3424_v21 = vpop.eup %3423 }
0x17da   : > { %v2105_v1 = vsel %vm603_vm2, %v3424_v21, 0.0 }
0x17db   : > { %2106 = vadd.xlane.f32.xlu0 %v2105_v1 }
0x17dd   : > { %v3426_v22 = vpop.eup %3425 }
0x17de   : > { %v3428_v23 = vpop.eup %3427  ;;  %v2108_v25 = vsel %vm603_vm2, %v3426_v22, 0.0 }
0x17df   : > { %2109 = vadd.xlane.f32.xlu0 %v2108_v25  ;;  %v2111_v10 = vsel %vm603_vm2, %v3428_v23, 0.0 }
0x17e0   : > { %2112 = vadd.xlane.f32.xlu1 %v2111_v10 }
0x17f1   : > { %2122 = vrot.lane.b32.xlu1 %v3972_v37, %s4288_s12 }
0x17f5   : > { %2190 = vrot.lane.b32.xlu1 %v3968_v55, %s4289_s22  ;;  %2124 = vrot.lane.b32.xlu0 %v3968_v55, %s4288_s12 }
0x17f9   : > { %2188 = vrot.lane.b32.xlu1 %v3972_v37, %s4289_s22  ;;  %2184 = vrot.lane.b32.xlu0 %v3972_v37, %s4290_s26  ;;  %s2739_s22 = scalar_lea.hbm %s4256_s11, %s2902_s25 }
0x17fd   : > { %2186 = vrot.lane.b32.xlu1 %v3968_v55, %s4290_s26 }
0x1864   : > { %v2107_v26 = vpop.xlane.xlu0 %2106 }
0x1865   : > { %3429 = vrcp.f32 %v2107_v26 }
0x1868   : > { %v2110_v16 = vpop.xlane.xlu0 %2109 }
0x1869   : > { %v2113_v27 = vpop.xlane.xlu1 %2112  ;;  %3431 = vrcp.f32 %v2110_v16 }
0x186a   : > { %3433 = vrcp.f32 %v2113_v27 }
0x186c   : > { %v2125_v28 = vpop.permute.xlu0 %2124 }
0x186d   : > { %v2123_v29 = vpop.permute.xlu1 %2122  ;;  %v2134_v14 = vsel %vm650_vm3, %v2125_v28, 0  ;;  %3225 = vmatprep.subr.msk.bf16.mxu1 %vm650_vm3, %v2125_v28 }
0x186e   : > { %3154 = vmatpush3.bf16.msra.mxu1 %v2134_v14 }
0x186f   : > { %3155 = vmatprep.subr.bf16.mxu1 %v2123_v29 }
0x1870   : > { %v2185_v43 = vpop.permute.xlu0 %2184 }
0x1871   : > { %v2191_v33 = vpop.permute.xlu1 %2190 }
0x1872   : > { %3156 = vmatpush3.bf16.msra.mxu1 %v2123_v29  ;;  %v3430_v34 = vpop.eup %3429  ;;  %v2202_v2 = vsel %vm542_vm1, %v2191_v33, 0 }
0x1873   : > { %3226 = vmatprep.subr.msk.bf16.mxu1 %vm542_vm1, %v2191_v33  ;;  %v2117_v36 = vmul.f32 %v3430_v34, %v3424_v21 }
0x1875   : > { %v2189_v48 = vpop.permute.xlu1 %2188 }
0x1876   : > { %v3432_v0 = vpop.eup %3431  ;;  %v2199_v49 = vsel %vm542_vm1, %v2189_v48, 0 }
0x1877   : > { %v3434_v35 = vpop.eup %3433  ;;  %v2118_v60 = vmul.f32 %v3432_v0, %v3426_v22 }
0x1878   : > { %v2119_v63 = vmul.f32 %v3434_v35, %v3428_v23 }
0x1879   : > { %v2120_v59 = vpack.c.bf16 %v2118_v60, %v2117_v36  ;;  %v2187_v51 = vpop.permute.xlu1 %2186 }
0x187a   : > { %v2121_v62 = vpack.c.bf16 %v2119_v63, %v2119_v63 }
0x187b   : > { %3157 = vmatprep.mubr.msk.bf16.mxu1 %vm603_vm2, %v2120_v59  ;;  %v3325_v59 = vld [vmem:[%s4251_s6 + $0x18] sm:$0xff]  }
0x187c   : > { %3158 = vmatmul.mubr.msk.bf16.vlgmr.msra.gmra.mxu1 %vm603_vm2, %v2121_v62  ;;  %v3326_v62 = vld [vmem:[%s4251_s6 + $0x10] sm:$0xff]  }
0x187d   : > { %3162 = vmatpush3.bf16.xpose.msra.mxu1 %v2202_v2  ;;  %3165 = vmatprep.mubr.msk.bf16.mxu1 %vm542_vm1, %v2185_v43 }
0x187e   : > { %3227 = vmatprep.subr.msk.bf16.mxu1 %vm542_vm1, %v2189_v48 }
0x1885   : > { %3164 = vmatpush3.bf16.xpose.msra.mxu1 %v2199_v49 }
0x188c   : > { %3166 = vmatmul.mubr.msk.bf16.vlgmr.msra.gmra.mxu1 %vm542_vm1, %v2187_v51 }
0x193c   : > { %v3159_v53 = vpop.f32.mrf.mxu1 }
0x193e   : > { %v2170_v57 = vpop.f32.mrf.mxu1 }
0x1940   : > { %v3160_v58 = vpop.f32.mrf.mxu1 }
0x1942   : > { %v2173_v61 = vpop.f32.mrf.mxu1 }
0x1943   : > { %v3303_v5 = vpack.i.bf16 %v2173_v61, %v2170_v57 }
0x194c   : > { %v3167_v6 = vpop.f32.mrf.mxu1 }
0x194d   : > { %v2247_v12 = vadd.f32 %v4000_v52, %v3167_v6 }
0x194e   : > { %v2238_v8 = vpop.f32.mrf.mxu1 }
0x194f   : > { %v2239_v9 = vadd.f32 %v3987_v44, %v2238_v8  ;;  %v2258_v19 = vsel %vm603_vm2, %v2247_v12, -inf }
0x1950   : > { %v3168_v11 = vpop.f32.mrf.mxu1 }
0x1951   : > { %v2252_v13 = vsel %vm603_vm2, %v2239_v9, -inf }
0x1952   : > { %v2241_v15 = vpop.f32.mrf.mxu1  ;;  %2253 = vmax.xlane.f32.xlu0 %v2252_v13 }
0x1953   : > { %v2242_v17 = vadd.f32 %v3994_v50, %v2241_v15 }
0x1955   : > { %v2255_v18 = vsel %vm603_vm2, %v2242_v17, -inf }
0x1956   : > { %2256 = vmax.xlane.f32.xlu1 %v2255_v18  ;;  %2259 = vmax.xlane.f32.xlu0 %v2258_v19 }
0x19db   : > { %v2254_v20 = vpop.xlane.xlu0 %2253 }
0x19dc   : > { %v2261_v21 = vsub.f32 %v2239_v9, %v2254_v20 }
0x19de   : > { %v2264_v1 = vmul.f32 1.442695, %v2261_v21 }
0x19df   : > { %v2257_v22 = vpop.xlane.xlu1 %2256  ;;  %v2260_v44 = vpop.xlane.xlu0 %2259 }
0x19e0   : > { %3435 = vpow2.f32 %v2264_v1  ;;  %v2262_v23 = vsub.f32 %v2242_v17, %v2257_v22  ;;  %v2263_v52 = vsub.f32 %v2247_v12, %v2260_v44 }
0x19e2   : > { %v2266_v25 = vmul.f32 1.442695, %v2262_v23  ;;  %v2268_v10 = vmul.f32 1.442695, %v2263_v52 }
0x19e4   : > { %3437 = vpow2.f32 %v2266_v25 }
0x19e5   : > { %3439 = vpow2.f32 %v2268_v10 }
0x19ed   : > { %v3436_v26 = vpop.eup %3435 }
0x19ee   : > { %v2270_v50 = vsel %vm603_vm2, %v3436_v26, 0.0 }
0x19ef   : > { %2271 = vadd.xlane.f32.xlu0 %v2270_v50 }
0x19f1   : > { %v3438_v16 = vpop.eup %3437 }
0x19f2   : > { %v3440_v27 = vpop.eup %3439  ;;  %v2273_v28 = vsel %vm603_vm2, %v3438_v16, 0.0 }
0x19f3   : > { %2274 = vadd.xlane.f32.xlu0 %v2273_v28  ;;  %v2276_v29 = vsel %vm603_vm2, %v3440_v27, 0.0 }
0x19f4   : > { %2277 = vadd.xlane.f32.xlu1 %v2276_v29 }
0x1a05   : > { %2287 = vrot.lane.b32.xlu1 %v3972_v37, %s4291_s29 }
0x1a09   : > { %3299 = vrot.lane.b32.xlu1 %v3298_v47, %s4292_s15  ;;  %2289 = vrot.lane.b32.xlu0 %v3968_v55, %s4291_s29 }
0x1a0d   : > { %2356 = vrot.lane.b32.xlu1 %v4067_v38, %s4292_s15  ;;  %3304 = vrot.lane.b32.xlu0 %v3303_v5, %s4293_s16  ;;  %s3534_s15 = smov [#allocation2]  }
0x1a0e   : > { %s3462_s0 = sshll.u32 %s3534_s15, 4  ;;  %s3463_s0 = int_to_ptr.vmem [resolvable:$false] %s3462_s0 }
0x1a0f   : > { %s3464_s21 = scalar_lea.vmem %s3463_s0, 256 }
0x1a11   : > { %2368 = vrot.lane.b32.xlu1 %v3159_v53, %s4293_s16  ;;  %s377_s16 = sand.u32 1, %s3510_s18  }
0x1a12   : > { %s2804_s24 = sshll.u32 %s377_s16, 3  ;;  %s2728_s26 = scalar_lea.sflag [#allocation3], %s377_s16 }
0x1a13   : > { %s379_s13 = scalar_lea.vmem [#allocation2], %s2804_s24 }
0x1a14   : > { %s2741_s14 = sshll.u32 %s379_s13, 4  ;;  %s2742_s14 = int_to_ptr.vmem [resolvable:$true] %s2741_s14 }
0x1a15   : > { %s3458_s29 = scalar_lea.vmem %s2742_s14, 128  ;;  %p3465_p0 = scmp.lt.s32.totalorder %s2742_s14, %s3463_s0 }
0x1a16   : > { %p3459_p11 = scmp.ne.s32.totalorder %s2742_s14, %s3458_s29  ;;  %p3466_p1 = scmp.lt.s32.totalorder %s3464_s21, %s3458_s29 }
0x1a18   : > { %p3460_p12 = pnand %p3459_p11, %p3633_p5  ;;  %p3467_p2 = por %p3466_p1, %p3465_p0 }
0x1a1a   : > { %p3461_p13 = pneg %p3460_p12 }
0x1a1c   : > { %p3468_p3 = pnand %p3467_p2, %p3461_p13 }
0x1a78   : > { %v2272_v14 = vpop.xlane.xlu0 %2271 }
0x1a79   : > { %3441 = vrcp.f32 %v2272_v14 }
0x1a7c   : > { %v2275_v33 = vpop.xlane.xlu0 %2274 }
0x1a7d   : > { %v2278_v34 = vpop.xlane.xlu1 %2277  ;;  %3443 = vrcp.f32 %v2275_v33 }
0x1a7e   : > { %3445 = vrcp.f32 %v2278_v34 }
0x1a80   : > { %v2290_v37 = vpop.permute.xlu0 %2289 }
0x1a81   : > { %v2299_v42 = vsel %vm650_vm3, %v2290_v37, 0  ;;  %3228 = vmatprep.subr.msk.bf16.mxu0 %vm650_vm3, %v2290_v37  ;;  %v2288_v46 = vpop.permute.xlu1 %2287 }
0x1a82   : > { %3170 = vmatpush3.bf16.msra.mxu0 %v2299_v42 }
0x1a83   : > { %3171 = vmatprep.subr.bf16.mxu0 %v2288_v46 }
0x1a84   : > { %v3305_v5 = vpop.permute.xlu0 %3304 }
0x1a85   : > { %v3300_v53 = vpop.permute.xlu1 %3299  ;;  %v3307_v8 = vunpack.i.h.bf16 %v3305_v5  ;;  %v3306_v9 = vunpack.i.l.bf16 %v3305_v5 }
0x1a86   : > { %3172 = vmatpush3.bf16.msra.mxu0 %v2288_v46  ;;  %v3442_v55 = vpop.eup %3441  ;;  %v3302_v58 = vunpack.i.h.bf16 %v3300_v53  ;;  %v3301_v61 = vunpack.i.l.bf16 %v3300_v53 }
0x1a87   : > { %v2282_v0 = vmul.f32 %v3442_v55, %v3436_v26  ;;  %3177 = vmatprep.subr.bf16.mxu0 %v3325_v59 }
0x1a88   : > { %v2386_v11 = vsel %vm542_vm1, %v4034_v41, %v3302_v58  ;;  %v2385_v12 = vsel %vm542_vm1, %v4032_v56, %v3301_v61 }
0x1a89   : > { %v2357_v57 = vpop.permute.xlu1 %2356  ;;  %v2389_v21 = vsel %vm1236_vm4, %v2386_v11, %v3307_v8  ;;  %v2388_v1 = vsel %vm1236_vm4, %v2385_v12, %v3306_v9 }
0x1a8a   : > { %v3444_v38 = vpop.eup %3443  ;;  %v2387_v15 = vsel %vm542_vm1, %v4030_v54, %v2357_v57  ;;  %v4156_v54 = vld [vmem:[%s4255_s10 + $0x8] sm:$0xff] }
0x1a8b   : > { %v3446_v47 = vpop.eup %3445  ;;  %v2283_v35 = vmul.f32 %v3444_v38, %v3438_v16  ;;  %v2404_v52 = vrot.slane %v4156_v54, %v3672_v40  ;;  %v2516_v12 = vrot.slane %v4156_v54, %v3679_v45  ;;  %v3330_v45 = vld [vmem:[%s4254_s9 + $0x30] sm:$0xff]  }
0x1a8c   : > { %v2284_v36 = vmul.f32 %v3446_v47, %v3440_v27 }
0x1a8d   : > { %v2285_v60 = vpack.c.bf16 %v2283_v35, %v2282_v0  ;;  %v2369_v6 = vpop.permute.xlu1 %2368 }
0x1a8e   : > { %v2286_v63 = vpack.c.bf16 %v2284_v36, %v2284_v36  ;;  %v2390_v18 = vsel %vm1236_vm4, %v2387_v15, %v2369_v6 }
0x1a8f   : > { %3173 = vmatprep.mubr.msk.bf16.mxu0 %vm603_vm2, %v2285_v60 }
0x1a90   : > { %3174 = vmatmul.mubr.msk.bf16.vlgmr.msra.gmra.mxu0 %vm603_vm2, %v2286_v63 }
0x1a91   : > { %3178 = vmatpush3.bf16.msra.mxu0 %v3325_v59 }
0x1a92   : > { %3179 = vmatprep.subr.bf16.mxu0 %v3326_v62 }
0x1a95   : > { %3180 = vmatpush3.bf16.msra.mxu0 %v3326_v62 }
0x1b50   : > { %v3175_v2 = vpop.f32.mrf.mxu0 }
0x1b51   : > { %2380 = vrot.lane.b32.xlu1 %v3175_v2, %s4294_s30  ;;  %v3327_v2 = vld [vmem:[%s4252_s7 + $0x18] sm:$0xff]  }
0x1b52   : > { %v2335_v43 = vpop.f32.mrf.mxu0  ;;  %3185 = vmatprep.subr.bf16.mxu1 %v3327_v2 }
0x1b53   : > { %3186 = vmatpush3.bf16.msra.mxu1 %v3327_v2  ;;  %v2719_v2 = vrot.slane %v4156_v54, %v1594_v3 }
0x1b54   : > { %v3176_v48 = vpop.f32.mrf.mxu0 }
0x1b55   : > { %v3329_v48 = vld [vmem:[%s4254_s9 + $0x38] sm:$0xff]  }
0x1b56   : > { %v2338_v49 = vpop.f32.mrf.mxu0  ;;  %3193 = vmatprep.subr.bf16.mxu0 %v3329_v48 }
0x1b57   : > { %v3308_v51 = vpack.i.bf16 %v2338_v49, %v2335_v43  ;;  %v3328_v43 = vld [vmem:[%s4252_s7 + $0x10] sm:$0xff]  }
0x1b58   : > { %3187 = vmatprep.subr.bf16.mxu1 %v3328_v43 }
0x1b59   : > { %3309 = vrot.lane.b32.xlu0 %v3308_v51, %s4294_s30  ;;  %3188 = vmatpush3.bf16.msra.mxu1 %v3328_v43 }
0x1bc3   : > { %v2381_v13 = vpop.permute.xlu1 %2380 }
0x1bc4   : > { %v2393_v22 = vsel %vm603_vm2, %v2390_v18, %v2381_v13 }
0x1bc5   : > { %v2395_v23 = vpack.c.bf16 %v2393_v22, %v2393_v22 }
0x1bcb   : > { %v3310_v17 = vpop.permute.xlu0 %3309 }
0x1bcc   : > { %v3312_v19 = vunpack.i.h.bf16 %v3310_v17  ;;  %v3311_v20 = vunpack.i.l.bf16 %v3310_v17 }
0x1bce   : > { %v2391_v41 = vsel %vm603_vm2, %v2388_v1, %v3311_v20  ;;  %v2392_v44 = vsel %vm603_vm2, %v2389_v21, %v3312_v19  ;;  %v2523_v20 = vrot.slane %v4156_v54, %v1370_v7  ;;  %v3331_v7 = vld [vmem:[%s4254_s9 + $0x28] sm:$0xff]  }
0x1bcf   : > { %v2394_v56 = vpack.c.bf16 %v2392_v44, %v2391_v41 }
0x1bd1   : > { %3181 = vmatprep.mubr.msk.bf16.mxu0 %vm396_vm0, %v2394_v56 }
0x1bd2   : > { %3182 = vmatmul.mubr.msk.bf16.vlgmr.msra.gmra.mxu0 %vm396_vm0, %v2395_v23 }
0x1bd3   : > { %3194 = vmatpush3.bf16.msra.mxu0 %v3329_v48 }
0x1bd4   : > { %3195 = vmatprep.subr.bf16.mxu0 %v3330_v45 }
0x1bd7   : > { %3196 = vmatpush3.bf16.msra.mxu0 %v3330_v45 }
0x1bd8   : > { %3197 = vmatprep.subr.bf16.mxu0 %v3331_v7 }
0x1bdb   : > { %3198 = vmatpush3.bf16.msra.mxu0 %v3331_v7 }
0x1c92   : > { %v3183_v25 = vpop.f32.mrf.mxu0 }
0x1c93   : > { %v2466_v26 = vadd.f32 %v3183_v25, %v2404_v52 }
0x1c94   : > { %v2457_v10 = vpop.f32.mrf.mxu0 }
0x1c95   : > { %v2458_v50 = vadd.f32 %v2457_v10, %v2404_v52  ;;  %v2473_v29 = vadd.f32 %v2466_v26, %v3953_v30  ;;  %v2882_v10 = vld [vmem:[%s4253_s8 + $0x1] ss:$0 sm:$0xff] }
0x1c96   : > { %v3184_v16 = vpop.f32.mrf.mxu0 }
0x1c97   : > { %v2471_v27 = vadd.f32 %v2458_v50, %v3955_v31  ;;  %v2480_v40 = vsel %vm396_vm0, %v2473_v29, 0.0 }
0x1c98   : > { %v2460_v28 = vpop.f32.mrf.mxu0 }
0x1c99   : > { %v2461_v14 = vadd.f32 %v2460_v28, %v2404_v52  ;;  %v2474_v33 = vsel %vm396_vm0, %v2471_v27, 0.0  ;;  %v3332_v52 = vld [vmem:[%s4254_s9 + $0x20] sm:$0xff]  }
0x1c9a   : > { %2475 = vadd.xlane.f32.xlu0 %v2474_v33  ;;  %3199 = vmatprep.subr.bf16.mxu0 %v3332_v52 }
0x1c9b   : > { %v2472_v34 = vadd.f32 %v2461_v14, %v3957_v32  ;;  %3200 = vmatpush3.bf16.msra.mxu0 %v3332_v52 }
0x1c9d   : > { %v2477_v37 = vsel %vm396_vm0, %v2472_v34, 0.0 }
0x1c9e   : > { %2478 = vadd.xlane.f32.xlu1 %v2477_v37  ;;  %2481 = vadd.xlane.f32.xlu0 %v2480_v40 }
0x1d23   : > { %v2476_v42 = vpop.xlane.xlu0 %2475 }
0x1d24   : > { %v2483_v46 = vmul.f32 0.03125, %v2476_v42  ;;  %v2625_v42 = vrot.slane %v4156_v54, %v1469_v4 }
0x1d26   : > { %v2486_v55 = vsub.f32 %v2471_v27, %v2483_v46 }
0x1d27   : > { %v2479_v38 = vpop.xlane.xlu1 %2478  ;;  %v2482_v31 = vpop.xlane.xlu0 %2481 }
0x1d28   : > { %v2484_v47 = vmul.f32 0.03125, %v2479_v38  ;;  %v2485_v0 = vmul.f32 0.03125, %v2482_v31  ;;  %v2489_v30 = vmul.f32 %v2486_v55, %v2486_v55 }
0x1d2a   : > { %v2487_v35 = vsub.f32 %v2472_v34, %v2484_v47  ;;  %v2488_v36 = vsub.f32 %v2473_v29, %v2485_v0  ;;  %v2492_v60 = vsel %vm396_vm0, %v2489_v30, 0.0 }
0x1d2b   : > { %2493 = vadd.xlane.f32.xlu0 %v2492_v60 }
0x1d2c   : > { %v2490_v32 = vmul.f32 %v2487_v35, %v2487_v35  ;;  %v2491_v63 = vmul.f32 %v2488_v36, %v2488_v36 }
0x1d2e   : > { %v2495_v59 = vsel %vm396_vm0, %v2490_v32, 0.0  ;;  %v2498_v62 = vsel %vm396_vm0, %v2491_v63, 0.0 }
0x1d2f   : > { %2496 = vadd.xlane.f32.xlu0 %v2495_v59  ;;  %2499 = vadd.xlane.f32.xlu1 %v2498_v62 }
0x1db4   : > { %v2494_v49 = vpop.xlane.xlu0 %2493 }
0x1db5   : > { %v2501_v51 = vmul.f32 0.03125, %v2494_v49  ;;  %v2724_v49 = vrot.slane %v4156_v54, %v1601_v24 }
0x1db7   : > { %v2504_v53 = vadd.f32 1e-05, %v2501_v51 }
0x1db8   : > { %v2500_v57 = vpop.xlane.xlu1 %2499  ;;  %v2497_v58 = vpop.xlane.xlu0 %2496 }
0x1db9   : > { %3447 = vrsqrt.f32 %v2504_v53  ;;  %v2503_v61 = vmul.f32 0.03125, %v2500_v57  ;;  %v2502_v5 = vmul.f32 0.03125, %v2497_v58 }
0x1dbb   : > { %v2506_v6 = vadd.f32 1e-05, %v2503_v61  ;;  %v2505_v8 = vadd.f32 1e-05, %v2502_v5 }
0x1dbd   : > { %3449 = vrsqrt.f32 %v2506_v6 }
0x1dbe   : > { %3451 = vrsqrt.f32 %v2505_v8 }
0x1dc6   : > { %v3448_v9 = vpop.eup %3447 }
0x1dc7   : > { %v2510_v11 = vmul.f32 %v3448_v9, %v2486_v55 }
0x1dc9   : > { %v2517_v19 = vmul.f32 %v2516_v12, %v2510_v11 }
0x1dca   : > { %v3450_v13 = vpop.eup %3449 }
0x1dcb   : > { %v3452_v15 = vpop.eup %3451  ;;  %v2512_v17 = vmul.f32 %v3450_v13, %v2488_v36  ;;  %v2524_v41 = vadd.f32 %v2523_v20, %v2517_v19 }
0x1dcc   : > { %v2511_v18 = vmul.f32 %v3452_v15, %v2487_v35 }
0x1dcd   : > { %v2519_v21 = vmul.f32 %v2516_v12, %v2512_v17 }
0x1dce   : > { %v2518_v1 = vmul.f32 %v2516_v12, %v2511_v18 }
0x1dcf   : > { %v2526_v22 = vadd.f32 %v2523_v20, %v2519_v21 }
0x1dd0   : > { %v2525_v44 = vadd.f32 %v2523_v20, %v2518_v1 }
0x1dd1   : > { %v2528_v56 = vpack.c.bf16 %v2526_v22, %v2526_v22 }
0x1dd2   : > { %v2527_v23 = vpack.c.bf16 %v2525_v44, %v2524_v41 }
0x1dd4   : > { %3189 = vmatprep.mubr.msk.bf16.mxu1 %vm396_vm0, %v2527_v23 }
0x1dd5   : > { %3190 = vmatmul.mubr.msk.bf16.vlgmr.msra.gmra.mxu1 %vm396_vm0, %v2528_v56 }
0x1e95   : > { %v3191_v25 = vpop.f32.mrf.mxu1 }
0x1e96   : > { %v2603_v50 = vadd.f32 %v3191_v25, %v2882_v10 }
0x1e97   : > { %v2594_v26 = vpop.f32.mrf.mxu1 }
0x1e98   : > { %v2595_v27 = vadd.f32 %v2882_v10, %v2594_v26  ;;  %v2610_v14 = vmax.f32 %v2603_v50, 0.0 }
0x1e99   : > { %v3192_v16 = vpop.f32.mrf.mxu1 }
0x1e9a   : > { %v2608_v33 = vmax.f32 %v2595_v27, 0.0  ;;  %v2612_v40 = vpack.c.bf16 %v2610_v14, %v2610_v14 }
0x1e9b   : > { %v2597_v28 = vpop.f32.mrf.mxu1 }
0x1e9c   : > { %v2598_v29 = vadd.f32 %v2882_v10, %v2597_v28 }
0x1e9e   : > { %v2609_v34 = vmax.f32 %v2598_v29, 0.0 }
0x1ea0   : > { %v2611_v37 = vpack.c.bf16 %v2609_v34, %v2608_v33 }
0x1ea2   : > { %3201 = vmatprep.mubr.msk.bf16.mxu0 %vm1495_vm5, %v2611_v37 }
0x1ea3   : > { %3202 = vmatmul.mubr.msk.bf16.vlgmr.msra.gmra.mxu0 %vm1495_vm5, %v2612_v40 }
0x1f63   : > { %v3203_v46 = vpop.f32.mrf.mxu0 }
0x1f65   : > { %v2690_v55 = vpop.f32.mrf.mxu0 }
0x1f66   : > { %v2691_v38 = vadd.f32 %v2690_v55, %v2625_v42 }
0x1f67   : > { %v3204_v31 = vpop.f32.mrf.mxu0 }
0x1f68   : > { %v2702_v47 = vadd.f32 %v2691_v38, %v2524_v41 }
0x1f69   : > { %v2693_v0 = vpop.f32.mrf.mxu0 }
0x1f6a   : > { %v2703_v30 = vsel %vm396_vm0, %v2702_v47, 0.0 }
0x1f6b   : > { %2704 = vadd.xlane.f32.xlu0 %v2703_v30 }
0x1ff4   : > { %v2705_v35 = vpop.xlane.xlu0 %2704 }
0x1ff5   : > { %v2706_v36 = vmul.f32 0.03125, %v2705_v35 }
0x1ff7   : > { %v2707_v60 = vsub.f32 %v2702_v47, %v2706_v36 }
0x1ff9   : > { %v2708_v32 = vmul.f32 %v2707_v60, %v2707_v60 }
0x1ffb   : > { %v2709_v63 = vsel %vm396_vm0, %v2708_v32, 0.0 }
0x1ffc   : > { %2710 = vadd.xlane.f32.xlu1 %v2709_v63 }
0x2085   : > { %v2711_v59 = vpop.xlane.xlu1 %2710 }
0x2086   : > { %v2712_v4 = vmul.f32 0.03125, %v2711_v59 }
0x2088   : > { %v2713_v62 = vadd.f32 1e-05, %v2712_v4 }
0x208a   : > { %3453 = vrsqrt.f32 %v2713_v62 }
0x2097   : > { %v3454_v43 = vpop.eup %3453 }
0x2098   : > { %v2715_v48 = vmul.f32 %v3454_v43, %v2707_v60 }
0x209a   : > { %v2720_v51 = vmul.f32 %v2719_v2, %v2715_v48 }
0x209c   : > { %v2725_v53 = vadd.f32 %v2724_v49, %v2720_v51 }
0x209e   : > { %2726 = vst.msk [vmem:[%s379_s13] sm:$0xff] %vm396_vm0, %v2725_v53 }
0x209f   : > { %3471 = shalt.err (!%p3468_p3)
}
0x20a0   : > { %s3472_s24 = scalar_lea.hbm %s2739_s22, 128  ;;  %s3476_s13 = scalar_lea.hbm %s4256_s11, 256 }
0x20a1   : > { %p3473_p4 = scmp.ne.s32.totalorder %s2739_s22, %s3472_s24  ;;  %p3477_p9 = scmp.lt.s32.totalorder %s2739_s22, %s4256_s11 }
0x20a2   : > { %p3478_p10 = scmp.lt.s32.totalorder %s3476_s13, %s3472_s24 }
0x20a3   : > { %p3474_p7 = pnand %p3473_p4, %p3633_p5 }
0x20a4   : > { %p3479_p11 = por %p3478_p10, %p3477_p9 }
0x20a5   : > { %p3475_p8 = pneg %p3474_p7 }
0x20a7   : > { %p3480_p12 = pnand %p3479_p11, %p3475_p8 }
0x20a9   : > { %3483 = shalt.err (!%p3480_p12)
}
0x20aa   : > { %3230 = dma.vmem_to_hbm [thread:$0]  (%p3633_p5), %s2742_s14, 128, %s2739_s22, %s2728_s26  }
0x20ab PF: > { %p3236_p13 = scmp.ge.s32.totalorder %s3518_s20, 2  ;;  %s2753_s0 = sand.u32 1, %s3506_s17  }
0x20ac   : > { %s2754_s29 = scalar_lea.sflag [#allocation3], %s2753_s0 }
0x20ad   : > { %p3233_p0 = pnand %p3236_p13, %p3637_p6 }
0x20af   : > { %p3234_p1 = pneg %p3233_p0 }
0x20b1   : > { %3501 = dma.done.wait (%p3234_p1), %s2754_s29, 128  }
0x20b2   : > { %3503 = vsyncadd (%p3234_p1), %s2754_s29, 4294967168  ;;  %s4295_s15 = sld [smem:[#allocation5_spill]]  ;;  %p21_p2 = scmp.ge.s32.totalorder %s3620_s23, 4  }
0x20b3   : > { %s4296_s17 = smov %s3510_s18  ;;  %s4297_s18 = smov %s3514_s19 }
0x20b4   : > { %s4299_s20 = smov %s3620_s23  ;;  %23 = sbr.rel (!%p21_p2) target bundleno = 5 (0x5), region = 106 }
0x20b8   : > { %s4298_s19 = smov %s4295_s15 }
0x20b9   :  { %2759 = vsyncpa [#allocation3], 1 }
0x20ba   :  { %2761 = vsyncpa [#allocation3 + $0x1], 1 }

</bundles_post_ra>
